<compile_context>
chip_gen: v5e
topology: v5e:2x2
jax: 0.10.0
libtpu: 0.0.40
codegen_flags: <defaults>
</compile_context>

<pallas_src>
import functools
import math

import jax
import jax.numpy as jnp
from jax.experimental import pallas as pl
from jax.experimental.pallas import tpu as pltpu


# ----------------------------------------------------------------------------
# Capability probe: single-buffering of grid-constant operands.
# ----------------------------------------------------------------------------
def _probe_copy_kernel(x_ref, o_ref):
    o_ref[...] = x_ref[...]


@functools.lru_cache(maxsize=1)
def _single_buffer_supported():
    """True if BlockSpec(pipeline_mode=pl.Buffered(1)) lowers on this backend.

    Single-buffering the grid-constant operands (W_hh, h0, c0) halves their
    VMEM footprint (a full extra W_hh copy at large H).  Probe once so an
    unsupported jax/libtpu combo silently falls back to default
    double-buffering instead of failing to compile.
    """
    if not hasattr(pl, "Buffered"):
        return False
    try:
        x = jnp.zeros((8, 128), jnp.float32)
        out = pl.pallas_call(
            _probe_copy_kernel,
            out_shape=jax.ShapeDtypeStruct((8, 128), jnp.float32),
            grid_spec=pltpu.PrefetchScalarGridSpec(
                num_scalar_prefetch=0,
                grid=(2,),
                in_specs=[pl.BlockSpec((8, 128), lambda t: (0, 0),
                                       pipeline_mode=pl.Buffered(1))],
                out_specs=pl.BlockSpec((8, 128), lambda t: (0, 0)),
            ),
        )(x)
        jax.block_until_ready(out)
        return True
    except Exception:
        return False


# ----------------------------------------------------------------------------
# VMEM-budget-derived time chunk.
# ----------------------------------------------------------------------------
def _vmem_capacity_bytes():
    """Physical VMEM per core; falls back to the smallest current part (v7x)."""
    try:
        info = pltpu.get_tpu_info()
        for name in ("vmem_capacity_bytes", "vmem_size_bytes", "vmem_bytes"):
            val = getattr(info, name, None)
            if val:
                return int(val)
    except Exception:
        pass
    return 64 * 1024 * 1024


def _derive_time_chunk(T, B, H, D, gx_bytes, out_bytes, single_buffer_consts,
                       time_chunk_cap=None):
    """Largest time chunk whose pipeline footprint fits the VMEM budget."""
    budget = (min(_vmem_capacity_bytes(), 128 * 1024 * 1024) * 3) // 4
    const_buf = 1 if single_buffer_consts else 2
    const_bytes = (const_buf * D * H * 4 * H * 4        # W_hh (f32)
                   + const_buf * 2 * D * B * H * 4      # h0 / c0
                   + 2 * 2 * D * B * H * out_bytes      # h_n / c_n outputs
                   + 2 * D * B * H * 4)                 # f32 h/c scratch
    per_step = (2 * D * B * 4 * H * gx_bytes            # gx blocks, double-buffered
                + 2 * D * B * H * out_bytes)            # out blocks, double-buffered
    slack = 2 * 1024 * 1024
    tc = max(1, (budget - const_bytes - slack) // per_step)
    tc = int(min(tc, T, 256))
    if time_chunk_cap is not None:
        tc = min(tc, int(time_chunk_cap))
    return max(1, tc), budget


# ----------------------------------------------------------------------------
# Pallas kernel: one LSTM layer, both directions fused, sequential time grid.
# gx already contains x @ W_ih + b, so each inner step is one small recurrent
# matmul per direction + gate elementwise in f32.
# ----------------------------------------------------------------------------
def _lstm_layer_kernel(num_directions, Tc, T_real, need_mask, unroll, *refs):
    D = num_directions
    gx_refs = refs[:D]                  # each (Tc, B, 4H) view of (D, Tp, B, 4H)
    whh_ref = refs[D]                   # (D, H, 4H)
    h0_ref = refs[D + 1]                # (D, B, H)
    c0_ref = refs[D + 2]                # (D, B, H)
    out_refs = refs[D + 3:2 * D + 3]    # each (Tc, B, H) view of (Tp, B, H)
    hn_ref = refs[2 * D + 3]            # (D, B, H)
    cn_ref = refs[2 * D + 4]            # (D, B, H)
    h_sc = refs[2 * D + 5]              # (D, B, H) f32, carried across grid steps
    c_sc = refs[2 * D + 6]

    t = pl.program_id(0)
    n_t = pl.num_programs(0)
    H = hn_ref.shape[-1]

    @pl.when(t == 0)
    def _():
        h_sc[...] = h0_ref[...].astype(jnp.float32)
        c_sc[...] = c0_ref[...].astype(jnp.float32)

    def step(s, carry):
        hs, cs = carry
        new_h, new_c = [], []
        for d in range(D):
            if d == 0:
                row = s                           # forward walk
                g_time = t * Tc + s
            else:
                row = Tc - 1 - s                  # backward walk, reversed chunk
                g_time = (n_t - 1 - t) * Tc + row
            gates = gx_refs[d][row].astype(jnp.float32)           # (B, 4H)
            # Only recurrent matmul per step; W_hh re-read from VMEM each
            # iteration (cheap vld) rather than held live across the chunk.
            gates = gates + jnp.dot(hs[d], whh_ref[d],
                                    preferred_element_type=jnp.float32)
            # Gate columns are pre-permuted to [i, f, o, g]: one contiguous
            # sigmoid over 3H lanes + one tanh over the trailing H lanes.
            sig = jax.nn.sigmoid(gates[:, :3 * H])
            i_g = sig[:, :H]
            f_g = sig[:, H:2 * H]
            o_g = sig[:, 2 * H:]
            g_g = jnp.tanh(gates[:, 3 * H:])
            c_new = f_g * cs[d] + i_g * g_g
            h_new = o_g * jnp.tanh(c_new)
            if need_mask:
                # Padded (time >= T_real) steps must not pollute the carried
                # state; their output rows land in the sliced-off tail.
                valid = g_time < T_real
                h_keep = jnp.where(valid, h_new, hs[d])
                c_keep = jnp.where(valid, c_new, cs[d])
            else:
                h_keep, c_keep = h_new, c_new
            out_refs[d][row] = h_new.astype(out_refs[d].dtype)
            new_h.append(h_keep)
            new_c.append(c_keep)
        return tuple(new_h), tuple(new_c)

    carry0 = (tuple(h_sc[d] for d in range(D)),
              tuple(c_sc[d] for d in range(D)))
    hs, cs = jax.lax.fori_loop(0, Tc, step, carry0, unroll=unroll)

    for d in range(D):
        h_sc[d] = hs[d]
        c_sc[d] = cs[d]

    @pl.when(t == n_t - 1)
    def _():
        hn_ref[...] = jnp.stack(hs, axis=0).astype(hn_ref.dtype)
        cn_ref[...] = jnp.stack(cs, axis=0).astype(cn_ref.dtype)


def lstm_layer(gx, w_hh_t, h0, c0, *, time_chunk, seq_len, out_dtype,
               vmem_limit_bytes, unroll, single_buffer_consts):
    """One LSTM layer (all directions) over the (possibly padded) sequence.

    gx:     (D, Tp, B, 4H) precomputed x @ W_ih + b (NOT pre-reversed for the
            backward direction -- reversal is done via index_map arithmetic).
    w_hh_t: (D, H, 4H); h0, c0: (D, B, H).
    Returns ([per-direction outputs (Tp, B, H), forward time order],
             h_n (D, B, H), c_n (D, B, H)).
    """
    D, Tp, B, G = gx.shape
    H = w_hh_t.shape[1]
    assert G == 4 * H and Tp % time_chunk == 0
    Tc = time_chunk
    n_t = Tp // Tc
    need_mask = Tp != seq_len

    const_kwargs = {}
    if single_buffer_consts:
        # Grid-constant operands: no point double-buffering them.
        const_kwargs = dict(pipeline_mode=pl.Buffered(1))

    # gx is passed once per direction with its own index_map: forward streams
    # time blocks in order, backward streams them reversed -- the reversal is
    # pure DMA index arithmetic, never an HBM copy/flip of gx or x.
    gx_specs = [pl.BlockSpec((None, Tc, B, 4 * H), lambda t: (0, t, 0, 0))]
    out_specs = [pl.BlockSpec((Tc, B, H), lambda t: (t, 0, 0))]
    if D == 2:
        gx_specs.append(pl.BlockSpec((None, Tc, B, 4 * H),
                                     lambda t: (1, n_t - 1 - t, 0, 0)))
        # Backward outputs are written already in forward time order.
        out_specs.append(pl.BlockSpec((Tc, B, H), lambda t: (n_t - 1 - t, 0, 0)))

    const3 = lambda t: (0, 0, 0)
    in_specs = gx_specs + [
        pl.BlockSpec((D, H, 4 * H), const3, **const_kwargs),
        pl.BlockSpec((D, B, H), const3, **const_kwargs),
        pl.BlockSpec((D, B, H), const3, **const_kwargs),
    ]
    out_specs = out_specs + [pl.BlockSpec((D, B, H), const3),
                             pl.BlockSpec((D, B, H), const3)]
    out_shape = tuple([jax.ShapeDtypeStruct((Tp, B, H), out_dtype)] * D
                      + [jax.ShapeDtypeStruct((D, B, H), out_dtype)] * 2)

    kernel = functools.partial(_lstm_layer_kernel, D, Tc, seq_len, need_mask,
                               max(1, min(unroll, Tc)))

    results = pl.pallas_call(
        kernel,
        out_shape=out_shape,
        grid_spec=pltpu.PrefetchScalarGridSpec(
            num_scalar_prefetch=0,
            grid=(n_t,),
            in_specs=in_specs,
            out_specs=out_specs,
            scratch_shapes=[pltpu.VMEM((D, B, H), jnp.float32),
                            pltpu.VMEM((D, B, H), jnp.float32)],
        ),
        compiler_params=pltpu.CompilerParams(
            dimension_semantics=("arbitrary",),
            vmem_limit_bytes=int(vmem_limit_bytes)),
    )(*([gx] * D), w_hh_t, h0, c0)

    return list(results[:D]), results[D], results[D + 1]


# ----------------------------------------------------------------------------
# Wrapper-side helpers.
# ----------------------------------------------------------------------------
def _permute_gates_ifog(w_ih_t, w_hh_t, b, H):
    """PyTorch gate order [i, f, g, o] -> [i, f, o, g] along the 4H column axis
    so the kernel runs one contiguous sigmoid over 3H and one tanh over H."""
    def perm(a):
        return jnp.concatenate(
            [a[..., :2 * H], a[..., 3 * H:4 * H], a[..., 2 * H:3 * H]], axis=-1)
    return perm(w_ih_t), perm(w_hh_t), perm(b)


def _input_projection(parts, w_ih_t, b, gates_dtype):
    """x @ W_ih + b for all timesteps & directions in one batched MXU matmul.

    parts: list of arrays whose last-dim concat is the layer input (Tp, B, I).
           Per-direction parts from the previous layer are consumed directly
           (each multiplies its own row slice of W_ih), so the (Tp, B, D*H)
           concat is never materialized between layers.
    Returns gx of shape (D, Tp, B, 4H) in gates_dtype (bf16 storage by default).
    """
    gx = None
    off = 0
    for p in parts:
        w = w_ih_t[:, off:off + p.shape[-1], :]
        term = jnp.einsum('tbi,dik->dtbk', p, w,
                          preferred_element_type=jnp.float32)
        gx = term if gx is None else gx + term
        off += p.shape[-1]
    gx = gx + b[:, None, None, :].astype(jnp.float32)
    return gx.astype(gates_dtype)


# ----------------------------------------------------------------------------
# LSTMFrame forward (glue in plain JAX, hot path in the Pallas kernel above).
# ----------------------------------------------------------------------------
def lstm_frame_forward(x, params, num_directions, init_state=None, *,
                       gates_dtype=jnp.bfloat16, time_chunk_cap=None, unroll=4):
    """
    x:      (T, B, input_size)
    params: params[layer] = (w_ih_t (D, I_l, 4H), w_hh_t (D, H, 4H), b (D, 4H))
            with PyTorch LSTMCell gate order [i, f, g, o] along the 4H axis.
    Returns (output (T, B, num_directions*H),
             (h_n, c_n) each (num_layers*num_directions, B, H)).
    """
    T, B, _ = x.shape
    D = num_directions
    num_layers = len(params)
    out_dtype = x.dtype

    single_buf = _single_buffer_supported()
    H_max = max(int(p[1].shape[1]) for p in params)
    tc, vmem_budget = _derive_time_chunk(
        T, B, H_max, D, jnp.dtype(gates_dtype).itemsize,
        jnp.dtype(out_dtype).itemsize, single_buf, time_chunk_cap)
    n_t = -(-T // tc)
    Tp = n_t * tc
    if Tp != T:
        # Pad the time axis so every grid block is full; padded steps are
        # masked out of the recurrent state in-kernel and the padded output
        # rows are sliced off at the end (handles prime / awkward T).
        x = jnp.pad(x, ((0, Tp - T), (0, 0), (0, 0)))

    if init_state is None:
        init_h = [jnp.zeros((D, B, int(p[1].shape[1])), out_dtype) for p in params]
        init_c = [jnp.zeros((D, B, int(p[1].shape[1])), out_dtype) for p in params]
    else:
        h0_all, c0_all = init_state  # (L*D, B, H)
        init_h = [h0_all[l * D:(l + 1) * D] for l in range(num_layers)]
        init_c = [c0_all[l * D:(l + 1) * D] for l in range(num_layers)]

    last_h, last_c = [], []
    parts = [x]  # per-direction feature parts; concat(parts, -1) == layer input
    for layer_idx, (w_ih_t, w_hh_t, b) in enumerate(params):
        H = int(w_hh_t.shape[1])
        w_ih_p, w_hh_p, b_p = _permute_gates_ifog(w_ih_t, w_hh_t, b, H)
        gx = _input_projection(parts, w_ih_p, b_p, gates_dtype)
        parts, h_n, c_n = lstm_layer(
            gx, w_hh_p, init_h[layer_idx], init_c[layer_idx],
            time_chunk=tc, seq_len=T, out_dtype=out_dtype,
            vmem_limit_bytes=vmem_budget, unroll=unroll,
            single_buffer_consts=single_buf)
        last_h.append(h_n)
        last_c.append(c_n)

    output = parts[0] if D == 1 else jnp.concatenate(parts, axis=-1)
    output = output[:T]
    h_n_all = jnp.concatenate(last_h, axis=0)   # order: l0d0, l0d1, l1d0, ...
    c_n_all = jnp.concatenate(last_c, axis=0)
    return output, (h_n_all, c_n_all)


# ----------------------------------------------------------------------------
# Pure-JAX reference (lax.scan) for correctness checking.
# ----------------------------------------------------------------------------
def _ref_direction(x, w_ih_t, w_hh_t, b, h0, c0, reverse):
    H = h0.shape[-1]
    xs = x[::-1] if reverse else x

    def step(carry, x_t):
        h, c = carry
        gates = x_t @ w_ih_t + h @ w_hh_t + b
        i = jax.nn.sigmoid(gates[:, 0 * H:1 * H])
        f = jax.nn.sigmoid(gates[:, 1 * H:2 * H])
        g = jnp.tanh(gates[:, 2 * H:3 * H])
        o = jax.nn.sigmoid(gates[:, 3 * H:4 * H])
        c = f * c + i * g
        h = o * jnp.tanh(c)
        return (h, c), h

    (hn, cn), outs = jax.lax.scan(step, (h0, c0), xs)
    if reverse:
        outs = outs[::-1]
    return outs, hn, cn


def _ref_forward(x, params, num_directions):
    B = x.shape[1]
    last_h, last_c = [], []
    layer_output = x
    for (w_ih_t, w_hh_t, b) in params:
        H = w_hh_t.shape[1]
        outs = []
        for d in range(num_directions):
            h0 = jnp.zeros((B, H), x.dtype)
            c0 = jnp.zeros((B, H), x.dtype)
            o, hn, cn = _ref_direction(layer_output, w_ih_t[d], w_hh_t[d],
                                       b[d], h0, c0, reverse=(d == 1))
            outs.append(o)
            last_h.append(hn)
            last_c.append(cn)
        layer_output = (jnp.concatenate(outs, axis=-1)
                        if num_directions == 2 else outs[0])
    return layer_output, (jnp.stack(last_h, 0), jnp.stack(last_c, 0))


# ----------------------------------------------------------------------------
# Deterministic parameter construction (PyTorch LSTMCell-style uniform init),
# direction-stacked: (D, I, 4H) / (D, H, 4H) / (D, 4H), gate order [i, f, g, o].
# ----------------------------------------------------------------------------
def make_params(key, input_size, hidden_size, num_layers, num_directions):
    k = 1.0 / math.sqrt(hidden_size)
    params = []
    for layer_idx in range(num_layers):
        in_sz = input_size if layer_idx == 0 else hidden_size * num_directions
        w_ih_list, w_hh_list, b_list = [], [], []
        for _ in range(num_directions):
            key, k1, k2, k3, k4 = jax.random.split(key, 5)
            w_ih = jax.random.uniform(k1, (4 * hidden_size, in_sz),
                                      jnp.float32, -k, k)
            w_hh = jax.random.uniform(k2, (4 * hidden_size, hidden_size),
                                      jnp.float32, -k, k)
            b_ih = jax.random.uniform(k3, (4 * hidden_size,),
                                      jnp.float32, -k, k)
            b_hh = jax.random.uniform(k4, (4 * hidden_size,),
                                      jnp.float32, -k, k)
            w_ih_list.append(w_ih.T)
            w_hh_list.append(w_hh.T)
            b_list.append(b_ih + b_hh)
        params.append((jnp.stack(w_ih_list, 0),
                       jnp.stack(w_hh_list, 0),
                       jnp.stack(b_list, 0)))
    return params


if __name__ == "__main__":
    T, B, I, H = 8, 2, 16, 32
    num_layers = 2
    num_directions = 2

    key = jax.random.PRNGKey(0)
    kx, kp = jax.random.split(key)
    x = jax.random.normal(kx, (T, B, I), jnp.float32)
    params = make_params(kp, I, H, num_layers, num_directions)

    _single_buffer_supported()  # prime the capability probe outside jit

    # --- default path: bf16 gate storage; time_chunk_cap=3 -> Tp=9, one padded
    #     step: exercises cross-chunk state carry, in-pipeline backward
    #     reversal and padded-timestep masking. -------------------------------
    fwd = jax.jit(functools.partial(lstm_frame_forward,
                                    num_directions=num_directions,
                                    time_chunk_cap=3))
    out, (h_n, c_n) = fwd(x, params)
    out = jax.block_until_ready(out)
    h_n = jax.block_until_ready(h_n)
    c_n = jax.block_until_ready(c_n)

    assert out.shape == (T, B, num_directions * H)
    assert h_n.shape == (num_layers * num_directions, B, H)
    assert c_n.shape == (num_layers * num_directions, B, H)

    out_ref, (h_ref, c_ref) = _ref_forward(x, params, num_directions)
    # bf16 storage of the x-projection -> looser tolerance vs f32 reference.
    assert jnp.allclose(out, out_ref, atol=2e-2, rtol=2e-2)
    assert jnp.allclose(h_n, h_ref, atol=2e-2, rtol=2e-2)
    assert jnp.allclose(c_n, c_ref, atol=2e-2, rtol=2e-2)

    # --- f32 gate storage: tight check of the recurrence math (no padding). --
    fwd32 = jax.jit(functools.partial(lstm_frame_forward,
                                      num_directions=num_directions,
                                      gates_dtype=jnp.float32,
                                      time_chunk_cap=4))
    out32, (h32, c32) = fwd32(x, params)
    out32 = jax.block_until_ready(out32)
    assert jnp.allclose(out32, out_ref, atol=2e-5, rtol=2e-5)
    assert jnp.allclose(h32, h_ref, atol=2e-5, rtol=2e-5)
    assert jnp.allclose(c32, c_ref, atol=2e-5, rtol=2e-5)

    # --- unidirectional, odd T (padding path), single layer. -----------------
    T1 = 7
    x1 = jax.random.normal(jax.random.PRNGKey(1), (T1, B, I), jnp.float32)
    params1 = make_params(jax.random.PRNGKey(2), I, H, 1, 1)
    fwd1 = jax.jit(functools.partial(lstm_frame_forward, num_directions=1,
                                     gates_dtype=jnp.float32,
                                     time_chunk_cap=2))
    out1, (h1, c1) = fwd1(x1, params1)
    out1 = jax.block_until_ready(out1)
    out1_ref, (h1_ref, c1_ref) = _ref_forward(x1, params1, 1)
    assert out1.shape == (T1, B, H)
    assert jnp.allclose(out1, out1_ref, atol=2e-5, rtol=2e-5)
    assert jnp.allclose(h1, h1_ref, atol=2e-5, rtol=2e-5)
    assert jnp.allclose(c1, c1_ref, atol=2e-5, rtol=2e-5)

    print("KERNEL_OK")
</pallas_src>

<mosaic_0001>
module attributes {stable_mosaic.version = 11 : i64} {
  func.func @_probe_copy_kernel(%arg0: i32, %arg1: memref<8x128xf32, #tpu.memory_space<vmem>>, %arg2: memref<8x128xf32, #tpu.memory_space<vmem>>) attributes {dimension_semantics = [#tpu.dimension_semantics<arbitrary>], iteration_bounds = array<i64: 2>, scalar_prefetch = 0 : i64, scratch_operands = 0 : i64, tpu.core_type = #tpu.core_type<tc>, window_params = [{pipeline_mode = #tpu.pipeline_mode<synchronous>, transform_indices = @transform_0, window_bounds = array<i64: 8, 128>}, {pipeline_mode = #tpu.pipeline_mode<synchronous>, transform_indices = @transform_1, window_bounds = array<i64: 8, 128>}]} {
    %c0 = arith.constant 0 : index
    %c0_0 = arith.constant 0 : index
    %0 = vector.load %arg1[%c0, %c0_0] : memref<8x128xf32, #tpu.memory_space<vmem>>, vector<8x128xf32>
    %c0_1 = arith.constant 0 : index
    %c0_2 = arith.constant 0 : index
    %1 = vector.load %arg2[%c0_1, %c0_2] : memref<8x128xf32, #tpu.memory_space<vmem>>, vector<8x128xf32>
    tpu.vector_store %arg2[%c0_1, %c0_2], %0 {strides = array<i32>} : memref<8x128xf32, #tpu.memory_space<vmem>>, vector<8x128xf32>,
    return
  }
  func.func @transform_0(%arg0: i32) -> (i32, i32) {
    %c0_i32 = arith.constant 0 : i32
    %c0_i32_0 = arith.constant 0 : i32
    %c0_i32_1 = arith.constant 0 : i32
    return %c0_i32, %c0_i32_0 : i32, i32
  }
  func.func @transform_1(%arg0: i32) -> (i32, i32) {
    %c0_i32 = arith.constant 0 : i32
    %c0_i32_0 = arith.constant 0 : i32
    %c0_i32_1 = arith.constant 0 : i32
    return %c0_i32, %c0_i32_0 : i32, i32
  }
}

module attributes {stable_mosaic.version = 11 : i64} {
  func.func @_lstm_layer_kernel(%arg0: i32, %arg1: memref<1x3x2x128xbf16, #tpu.memory_space<vmem>>, %arg2: memref<1x3x2x128xbf16, #tpu.memory_space<vmem>>, %arg3: memref<2x32x128xf32, #tpu.memory_space<vmem>>, %arg4: memref<2x2x32xf32, #tpu.memory_space<vmem>>, %arg5: memref<2x2x32xf32, #tpu.memory_space<vmem>>, %arg6: memref<3x2x32xf32, #tpu.memory_space<vmem>>, %arg7: memref<3x2x32xf32, #tpu.memory_space<vmem>>, %arg8: memref<2x2x32xf32, #tpu.memory_space<vmem>>, %arg9: memref<2x2x32xf32, #tpu.memory_space<vmem>>, %arg10: memref<2x2x32xf32, #tpu.memory_space<vmem>>, %arg11: memref<2x2x32xf32, #tpu.memory_space<vmem>>) attributes {dimension_semantics = [#tpu.dimension_semantics<arbitrary>], iteration_bounds = array<i64: 3>, scalar_prefetch = 0 : i64, scratch_operands = 2 : i64, tpu.core_type = #tpu.core_type<tc>, window_params = [{transform_indices = @transform_0, window_bounds = array<i64: 1, 3, 2, 128>}, {transform_indices = @transform_1, window_bounds = array<i64: 1, 3, 2, 128>}, {pipeline_mode = #tpu.pipeline_mode<synchronous>, transform_indices = @transform_2, window_bounds = array<i64: 2, 32, 128>}, {pipeline_mode = #tpu.pipeline_mode<synchronous>, transform_indices = @transform_3, window_bounds = array<i64: 2, 2, 32>}, {pipeline_mode = #tpu.pipeline_mode<synchronous>, transform_indices = @transform_4, window_bounds = array<i64: 2, 2, 32>}, {transform_indices = @transform_5, window_bounds = array<i64: 3, 2, 32>}, {transform_indices = @transform_6, window_bounds = array<i64: 3, 2, 32>}, {pipeline_mode = #tpu.pipeline_mode<synchronous>, transform_indices = @transform_7, window_bounds = array<i64: 2, 2, 32>}, {pipeline_mode = #tpu.pipeline_mode<synchronous>, transform_indices = @transform_8, window_bounds = array<i64: 2, 2, 32>}]} {
    %c0_i32 = arith.constant 0 : i32
    %0 = arith.cmpi eq, %arg0, %c0_i32 : i32
    %1 = arith.extui %0 : i1 to i32
    %c0_i32_0 = arith.constant 0 : i32
    %2 = arith.cmpi ne, %1, %c0_i32_0 : i32
    scf.if %2 {
      %c0_102 = arith.constant 0 : index
      %c0_103 = arith.constant 0 : index
      %c0_104 = arith.constant 0 : index
      %230 = vector.load %arg4[%c0_102, %c0_103, %c0_104] : memref<2x2x32xf32, #tpu.memory_space<vmem>>, vector<2x2x32xf32>
      %c0_105 = arith.constant 0 : index
      %c0_106 = arith.constant 0 : index
      %c0_107 = arith.constant 0 : index
      %231 = vector.load %arg10[%c0_105, %c0_106, %c0_107] : memref<2x2x32xf32, #tpu.memory_space<vmem>>, vector<2x2x32xf32>
      tpu.vector_store %arg10[%c0_105, %c0_106, %c0_107], %230 {strides = array<i32>} : memref<2x2x32xf32, #tpu.memory_space<vmem>>, vector<2x2x32xf32>,
      %c0_108 = arith.constant 0 : index
      %c0_109 = arith.constant 0 : index
      %c0_110 = arith.constant 0 : index
      %232 = vector.load %arg5[%c0_108, %c0_109, %c0_110] : memref<2x2x32xf32, #tpu.memory_space<vmem>>, vector<2x2x32xf32>
      %c0_111 = arith.constant 0 : index
      %c0_112 = arith.constant 0 : index
      %c0_113 = arith.constant 0 : index
      %233 = vector.load %arg11[%c0_111, %c0_112, %c0_113] : memref<2x2x32xf32, #tpu.memory_space<vmem>>, vector<2x2x32xf32>
      tpu.vector_store %arg11[%c0_111, %c0_112, %c0_113], %232 {strides = array<i32>} : memref<2x2x32xf32, #tpu.memory_space<vmem>>, vector<2x2x32xf32>,
    } else {
    }
    %c0 = arith.constant 0 : index
    %c0_1 = arith.constant 0 : index
    %c0_2 = arith.constant 0 : index
    %3 = vector.load %arg10[%c0, %c0_1, %c0_2] : memref<2x2x32xf32, #tpu.memory_space<vmem>>, vector<1x2x32xf32>
    %4 = vector.shape_cast %3 : vector<1x2x32xf32> to vector<2x32xf32>
    %c1 = arith.constant 1 : index
    %c0_3 = arith.constant 0 : index
    %c0_4 = arith.constant 0 : index
    %5 = vector.load %arg10[%c1, %c0_3, %c0_4] : memref<2x2x32xf32, #tpu.memory_space<vmem>>, vector<1x2x32xf32>
    %6 = vector.shape_cast %5 : vector<1x2x32xf32> to vector<2x32xf32>
    %c0_5 = arith.constant 0 : index
    %c0_6 = arith.constant 0 : index
    %c0_7 = arith.constant 0 : index
    %7 = vector.load %arg11[%c0_5, %c0_6, %c0_7] : memref<2x2x32xf32, #tpu.memory_space<vmem>>, vector<1x2x32xf32>
    %8 = vector.shape_cast %7 : vector<1x2x32xf32> to vector<2x32xf32>
    %c1_8 = arith.constant 1 : index
    %c0_9 = arith.constant 0 : index
    %c0_10 = arith.constant 0 : index
    %9 = vector.load %arg11[%c1_8, %c0_9, %c0_10] : memref<2x2x32xf32, #tpu.memory_space<vmem>>, vector<1x2x32xf32>
    %10 = vector.shape_cast %9 : vector<1x2x32xf32> to vector<2x32xf32>
    %c0_i32_11 = arith.constant 0 : i32
    %c3_i32 = arith.constant 3 : i32
    %11 = arith.muli %arg0, %c3_i32 : i32
    %12 = arith.addi %11, %c0_i32_11 : i32
    %c0_12 = arith.constant 0 : index
    %13 = arith.index_cast %c0_i32_11 : i32 to index
    %c0_13 = arith.constant 0 : index
    %c0_14 = arith.constant 0 : index
    %14 = vector.load %arg1[%c0_12, %13, %c0_13, %c0_14] : memref<1x3x2x128xbf16, #tpu.memory_space<vmem>>, vector<1x1x2x128xbf16>
    %15 = vector.shape_cast %14 : vector<1x1x2x128xbf16> to vector<2x128xbf16>
    %16 = arith.extf %15 : vector<2x128xbf16> to vector<2x128xf32>
    %c0_15 = arith.constant 0 : index
    %c0_16 = arith.constant 0 : index
    %c0_17 = arith.constant 0 : index
    %17 = vector.load %arg3[%c0_15, %c0_16, %c0_17] : memref<2x32x128xf32, #tpu.memory_space<vmem>>, vector<1x32x128xf32>
    %18 = vector.shape_cast %17 : vector<1x32x128xf32> to vector<32x128xf32>
    %cst = arith.constant dense<0.000000e+00> : vector<2x128xf32>
    %19 = tpu.matmul %4, %18, %cst {dimension_numbers = #tpu.dot_dimension_numbers<[1], [0], [0], [1], [0, 0, 1, 1], [], []>} : vector<2x32xf32>, vector<32x128xf32>, vector<2x128xf32> -> vector<2x128xf32>
    %20 = arith.addf %16, %19 : vector<2x128xf32>
    %21 = vector.extract_strided_slice %20 {offsets = [0, 0], sizes = [2, 96], strides = [1, 1]} : vector<2x128xf32> to vector<2x96xf32>
    %22 = arith.negf %21 : vector<2x96xf32>
    %23 = math.exp %22 : vector<2x96xf32>
    %cst_18 = arith.constant 1.000000e+00 : f32
    %24 = vector.broadcast %cst_18 : f32 to vector<2x96xf32>
    %25 = arith.addf %24, %23 : vector<2x96xf32>
    %26 = arith.divf %24, %25 : vector<2x96xf32>
    %27 = vector.extract_strided_slice %26 {offsets = [0, 0], sizes = [2, 32], strides = [1, 1]} : vector<2x96xf32> to vector<2x32xf32>
    %28 = vector.extract_strided_slice %26 {offsets = [0, 32], sizes = [2, 32], strides = [1, 1]} : vector<2x96xf32> to vector<2x32xf32>
    %29 = vector.extract_strided_slice %26 {offsets = [0, 64], sizes = [2, 32], strides = [1, 1]} : vector<2x96xf32> to vector<2x32xf32>
    %30 = vector.extract_strided_slice %20 {offsets = [0, 96], sizes = [2, 32], strides = [1, 1]} : vector<2x128xf32> to vector<2x32xf32>
    %31 = math.tanh %30 : vector<2x32xf32>
    %32 = arith.mulf %28, %8 : vector<2x32xf32>
    %33 = arith.mulf %27, %31 : vector<2x32xf32>
    %34 = arith.addf %32, %33 : vector<2x32xf32>
    %35 = math.tanh %34 : vector<2x32xf32>
    %36 = arith.mulf %29, %35 : vector<2x32xf32>
    %c8_i32 = arith.constant 8 : i32
    %37 = arith.cmpi slt, %12, %c8_i32 : i32
    %38 = arith.select %37, %36, %4 : vector<2x32xf32>
    %39 = arith.select %37, %34, %8 : vector<2x32xf32>
    %40 = arith.index_cast %c0_i32_11 : i32 to index
    %c0_19 = arith.constant 0 : index
    %c0_20 = arith.constant 0 : index
    %41 = vector.load %arg6[%40, %c0_19, %c0_20] : memref<3x2x32xf32, #tpu.memory_space<vmem>>, vector<1x2x32xf32>
    %42 = vector.shape_cast %41 : vector<1x2x32xf32> to vector<2x32xf32>
    %43 = vector.shape_cast %36 : vector<2x32xf32> to vector<1x2x32xf32>
    tpu.vector_store %arg6[%40, %c0_19, %c0_20], %43 {strides = array<i32>} : memref<3x2x32xf32, #tpu.memory_space<vmem>>, vector<1x2x32xf32>,
    %c2_i32 = arith.constant 2 : i32
    %44 = arith.subi %c2_i32, %c0_i32_11 : i32
    %c2_i32_21 = arith.constant 2 : i32
    %45 = arith.subi %c2_i32_21, %arg0 : i32
    %c3_i32_22 = arith.constant 3 : i32
    %46 = arith.muli %45, %c3_i32_22 : i32
    %47 = arith.addi %46, %44 : i32
    %c0_23 = arith.constant 0 : index
    %48 = arith.index_cast %44 : i32 to index
    %c0_24 = arith.constant 0 : index
    %c0_25 = arith.constant 0 : index
    %49 = vector.load %arg2[%c0_23, %48, %c0_24, %c0_25] : memref<1x3x2x128xbf16, #tpu.memory_space<vmem>>, vector<1x1x2x128xbf16>
    %50 = vector.shape_cast %49 : vector<1x1x2x128xbf16> to vector<2x128xbf16>
    %51 = arith.extf %50 : vector<2x128xbf16> to vector<2x128xf32>
    %c1_26 = arith.constant 1 : index
    %c0_27 = arith.constant 0 : index
    %c0_28 = arith.constant 0 : index
    %52 = vector.load %arg3[%c1_26, %c0_27, %c0_28] : memref<2x32x128xf32, #tpu.memory_space<vmem>>, vector<1x32x128xf32>
    %53 = vector.shape_cast %52 : vector<1x32x128xf32> to vector<32x128xf32>
    %cst_29 = arith.constant dense<0.000000e+00> : vector<2x128xf32>
    %54 = tpu.matmul %6, %53, %cst_29 {dimension_numbers = #tpu.dot_dimension_numbers<[1], [0], [0], [1], [0, 0, 1, 1], [], []>} : vector<2x32xf32>, vector<32x128xf32>, vector<2x128xf32> -> vector<2x128xf32>
    %55 = arith.addf %51, %54 : vector<2x128xf32>
    %56 = vector.extract_strided_slice %55 {offsets = [0, 0], sizes = [2, 96], strides = [1, 1]} : vector<2x128xf32> to vector<2x96xf32>
    %57 = arith.negf %56 : vector<2x96xf32>
    %58 = math.exp %57 : vector<2x96xf32>
    %cst_30 = arith.constant 1.000000e+00 : f32
    %59 = vector.broadcast %cst_30 : f32 to vector<2x96xf32>
    %60 = arith.addf %59, %58 : vector<2x96xf32>
    %61 = arith.divf %59, %60 : vector<2x96xf32>
    %62 = vector.extract_strided_slice %61 {offsets = [0, 0], sizes = [2, 32], strides = [1, 1]} : vector<2x96xf32> to vector<2x32xf32>
    %63 = vector.extract_strided_slice %61 {offsets = [0, 32], sizes = [2, 32], strides = [1, 1]} : vector<2x96xf32> to vector<2x32xf32>
    %64 = vector.extract_strided_slice %61 {offsets = [0, 64], sizes = [2, 32], strides = [1, 1]} : vector<2x96xf32> to vector<2x32xf32>
    %65 = vector.extract_strided_slice %55 {offsets = [0, 96], sizes = [2, 32], strides = [1, 1]} : vector<2x128xf32> to vector<2x32xf32>
    %66 = math.tanh %65 : vector<2x32xf32>
    %67 = arith.mulf %63, %10 : vector<2x32xf32>
    %68 = arith.mulf %62, %66 : vector<2x32xf32>
    %69 = arith.addf %67, %68 : vector<2x32xf32>
    %70 = math.tanh %69 : vector<2x32xf32>
    %71 = arith.mulf %64, %70 : vector<2x32xf32>
    %c8_i32_31 = arith.constant 8 : i32
    %72 = arith.cmpi slt, %47, %c8_i32_31 : i32
    %73 = arith.select %72, %71, %6 : vector<2x32xf32>
    %74 = arith.select %72, %69, %10 : vector<2x32xf32>
    %75 = arith.index_cast %44 : i32 to index
    %c0_32 = arith.constant 0 : index
    %c0_33 = arith.constant 0 : index
    %76 = vector.load %arg7[%75, %c0_32, %c0_33] : memref<3x2x32xf32, #tpu.memory_space<vmem>>, vector<1x2x32xf32>
    %77 = vector.shape_cast %76 : vector<1x2x32xf32> to vector<2x32xf32>
    %78 = vector.shape_cast %71 : vector<2x32xf32> to vector<1x2x32xf32>
    tpu.vector_store %arg7[%75, %c0_32, %c0_33], %78 {strides = array<i32>} : memref<3x2x32xf32, #tpu.memory_space<vmem>>, vector<1x2x32xf32>,
    %c1_i32 = arith.constant 1 : i32
    %c3_i32_34 = arith.constant 3 : i32
    %79 = arith.muli %arg0, %c3_i32_34 : i32
    %80 = arith.addi %79, %c1_i32 : i32
    %c0_35 = arith.constant 0 : index
    %81 = arith.index_cast %c1_i32 : i32 to index
    %c0_36 = arith.constant 0 : index
    %c0_37 = arith.constant 0 : index
    %82 = vector.load %arg1[%c0_35, %81, %c0_36, %c0_37] : memref<1x3x2x128xbf16, #tpu.memory_space<vmem>>, vector<1x1x2x128xbf16>
    %83 = vector.shape_cast %82 : vector<1x1x2x128xbf16> to vector<2x128xbf16>
    %84 = arith.extf %83 : vector<2x128xbf16> to vector<2x128xf32>
    %c0_38 = arith.constant 0 : index
    %c0_39 = arith.constant 0 : index
    %c0_40 = arith.constant 0 : index
    %85 = vector.load %arg3[%c0_38, %c0_39, %c0_40] : memref<2x32x128xf32, #tpu.memory_space<vmem>>, vector<1x32x128xf32>
    %86 = vector.shape_cast %85 : vector<1x32x128xf32> to vector<32x128xf32>
    %cst_41 = arith.constant dense<0.000000e+00> : vector<2x128xf32>
    %87 = tpu.matmul %38, %86, %cst_41 {dimension_numbers = #tpu.dot_dimension_numbers<[1], [0], [0], [1], [0, 0, 1, 1], [], []>} : vector<2x32xf32>, vector<32x128xf32>, vector<2x128xf32> -> vector<2x128xf32>
    %88 = arith.addf %84, %87 : vector<2x128xf32>
    %89 = vector.extract_strided_slice %88 {offsets = [0, 0], sizes = [2, 96], strides = [1, 1]} : vector<2x128xf32> to vector<2x96xf32>
    %90 = arith.negf %89 : vector<2x96xf32>
    %91 = math.exp %90 : vector<2x96xf32>
    %cst_42 = arith.constant 1.000000e+00 : f32
    %92 = vector.broadcast %cst_42 : f32 to vector<2x96xf32>
    %93 = arith.addf %92, %91 : vector<2x96xf32>
    %94 = arith.divf %92, %93 : vector<2x96xf32>
    %95 = vector.extract_strided_slice %94 {offsets = [0, 0], sizes = [2, 32], strides = [1, 1]} : vector<2x96xf32> to vector<2x32xf32>
    %96 = vector.extract_strided_slice %94 {offsets = [0, 32], sizes = [2, 32], strides = [1, 1]} : vector<2x96xf32> to vector<2x32xf32>
    %97 = vector.extract_strided_slice %94 {offsets = [0, 64], sizes = [2, 32], strides = [1, 1]} : vector<2x96xf32> to vector<2x32xf32>
    %98 = vector.extract_strided_slice %88 {offsets = [0, 96], sizes = [2, 32], strides = [1, 1]} : vector<2x128xf32> to vector<2x32xf32>
    %99 = math.tanh %98 : vector<2x32xf32>
    %100 = arith.mulf %96, %39 : vector<2x32xf32>
    %101 = arith.mulf %95, %99 : vector<2x32xf32>
    %102 = arith.addf %100, %101 : vector<2x32xf32>
    %103 = math.tanh %102 : vector<2x32xf32>
    %104 = arith.mulf %97, %103 : vector<2x32xf32>
    %c8_i32_43 = arith.constant 8 : i32
    %105 = arith.cmpi slt, %80, %c8_i32_43 : i32
    %106 = arith.select %105, %104, %38 : vector<2x32xf32>
    %107 = arith.select %105, %102, %39 : vector<2x32xf32>
    %108 = arith.index_cast %c1_i32 : i32 to index
    %c0_44 = arith.constant 0 : index
    %c0_45 = arith.constant 0 : index
    %109 = vector.load %arg6[%108, %c0_44, %c0_45] : memref<3x2x32xf32, #tpu.memory_space<vmem>>, vector<1x2x32xf32>
    %110 = vector.shape_cast %109 : vector<1x2x32xf32> to vector<2x32xf32>
    %111 = vector.shape_cast %104 : vector<2x32xf32> to vector<1x2x32xf32>
    tpu.vector_store %arg6[%108, %c0_44, %c0_45], %111 {strides = array<i32>} : memref<3x2x32xf32, #tpu.memory_space<vmem>>, vector<1x2x32xf32>,
    %c2_i32_46 = arith.constant 2 : i32
    %112 = arith.subi %c2_i32_46, %c1_i32 : i32
    %c2_i32_47 = arith.constant 2 : i32
    %113 = arith.subi %c2_i32_47, %arg0 : i32
    %c3_i32_48 = arith.constant 3 : i32
    %114 = arith.muli %113, %c3_i32_48 : i32
    %115 = arith.addi %114, %112 : i32
    %c0_49 = arith.constant 0 : index
    %116 = arith.index_cast %112 : i32 to index
    %c0_50 = arith.constant 0 : index
    %c0_51 = arith.constant 0 : index
    %117 = vector.load %arg2[%c0_49, %116, %c0_50, %c0_51] : memref<1x3x2x128xbf16, #tpu.memory_space<vmem>>, vector<1x1x2x128xbf16>
    %118 = vector.shape_cast %117 : vector<1x1x2x128xbf16> to vector<2x128xbf16>
    %119 = arith.extf %118 : vector<2x128xbf16> to vector<2x128xf32>
    %c1_52 = arith.constant 1 : index
    %c0_53 = arith.constant 0 : index
    %c0_54 = arith.constant 0 : index
    %120 = vector.load %arg3[%c1_52, %c0_53, %c0_54] : memref<2x32x128xf32, #tpu.memory_space<vmem>>, vector<1x32x128xf32>
    %121 = vector.shape_cast %120 : vector<1x32x128xf32> to vector<32x128xf32>
    %cst_55 = arith.constant dense<0.000000e+00> : vector<2x128xf32>
    %122 = tpu.matmul %73, %121, %cst_55 {dimension_numbers = #tpu.dot_dimension_numbers<[1], [0], [0], [1], [0, 0, 1, 1], [], []>} : vector<2x32xf32>, vector<32x128xf32>, vector<2x128xf32> -> vector<2x128xf32>
    %123 = arith.addf %119, %122 : vector<2x128xf32>
    %124 = vector.extract_strided_slice %123 {offsets = [0, 0], sizes = [2, 96], strides = [1, 1]} : vector<2x128xf32> to vector<2x96xf32>
    %125 = arith.negf %124 : vector<2x96xf32>
    %126 = math.exp %125 : vector<2x96xf32>
    %cst_56 = arith.constant 1.000000e+00 : f32
    %127 = vector.broadcast %cst_56 : f32 to vector<2x96xf32>
    %128 = arith.addf %127, %126 : vector<2x96xf32>
    %129 = arith.divf %127, %128 : vector<2x96xf32>
    %130 = vector.extract_strided_slice %129 {offsets = [0, 0], sizes = [2, 32], strides = [1, 1]} : vector<2x96xf32> to vector<2x32xf32>
    %131 = vector.extract_strided_slice %129 {offsets = [0, 32], sizes = [2, 32], strides = [1, 1]} : vector<2x96xf32> to vector<2x32xf32>
    %132 = vector.extract_strided_slice %129 {offsets = [0, 64], sizes = [2, 32], strides = [1, 1]} : vector<2x96xf32> to vector<2x32xf32>
    %133 = vector.extract_strided_slice %123 {offsets = [0, 96], sizes = [2, 32], strides = [1, 1]} : vector<2x128xf32> to vector<2x32xf32>
    %134 = math.tanh %133 : vector<2x32xf32>
    %135 = arith.mulf %131, %74 : vector<2x32xf32>
    %136 = arith.mulf %130, %134 : vector<2x32xf32>
    %137 = arith.addf %135, %136 : vector<2x32xf32>
    %138 = math.tanh %137 : vector<2x32xf32>
    %139 = arith.mulf %132, %138 : vector<2x32xf32>
    %c8_i32_57 = arith.constant 8 : i32
    %140 = arith.cmpi slt, %115, %c8_i32_57 : i32
    %141 = arith.select %140, %139, %73 : vector<2x32xf32>
    %142 = arith.select %140, %137, %74 : vector<2x32xf32>
    %143 = arith.index_cast %112 : i32 to index
    %c0_58 = arith.constant 0 : index
    %c0_59 = arith.constant 0 : index
    %144 = vector.load %arg7[%143, %c0_58, %c0_59] : memref<3x2x32xf32, #tpu.memory_space<vmem>>, vector<1x2x32xf32>
    %145 = vector.shape_cast %144 : vector<1x2x32xf32> to vector<2x32xf32>
    %146 = vector.shape_cast %139 : vector<2x32xf32> to vector<1x2x32xf32>
    tpu.vector_store %arg7[%143, %c0_58, %c0_59], %146 {strides = array<i32>} : memref<3x2x32xf32, #tpu.memory_space<vmem>>, vector<1x2x32xf32>,
    %c2_i32_60 = arith.constant 2 : i32
    %c3_i32_61 = arith.constant 3 : i32
    %147 = arith.muli %arg0, %c3_i32_61 : i32
    %148 = arith.addi %147, %c2_i32_60 : i32
    %c0_62 = arith.constant 0 : index
    %149 = arith.index_cast %c2_i32_60 : i32 to index
    %c0_63 = arith.constant 0 : index
    %c0_64 = arith.constant 0 : index
    %150 = vector.load %arg1[%c0_62, %149, %c0_63, %c0_64] : memref<1x3x2x128xbf16, #tpu.memory_space<vmem>>, vector<1x1x2x128xbf16>
    %151 = vector.shape_cast %150 : vector<1x1x2x128xbf16> to vector<2x128xbf16>
    %152 = arith.extf %151 : vector<2x128xbf16> to vector<2x128xf32>
    %c0_65 = arith.constant 0 : index
    %c0_66 = arith.constant 0 : index
    %c0_67 = arith.constant 0 : index
    %153 = vector.load %arg3[%c0_65, %c0_66, %c0_67] : memref<2x32x128xf32, #tpu.memory_space<vmem>>, vector<1x32x128xf32>
    %154 = vector.shape_cast %153 : vector<1x32x128xf32> to vector<32x128xf32>
    %cst_68 = arith.constant dense<0.000000e+00> : vector<2x128xf32>
    %155 = tpu.matmul %106, %154, %cst_68 {dimension_numbers = #tpu.dot_dimension_numbers<[1], [0], [0], [1], [0, 0, 1, 1], [], []>} : vector<2x32xf32>, vector<32x128xf32>, vector<2x128xf32> -> vector<2x128xf32>
    %156 = arith.addf %152, %155 : vector<2x128xf32>
    %157 = vector.extract_strided_slice %156 {offsets = [0, 0], sizes = [2, 96], strides = [1, 1]} : vector<2x128xf32> to vector<2x96xf32>
    %158 = arith.negf %157 : vector<2x96xf32>
    %159 = math.exp %158 : vector<2x96xf32>
    %cst_69 = arith.constant 1.000000e+00 : f32
    %160 = vector.broadcast %cst_69 : f32 to vector<2x96xf32>
    %161 = arith.addf %160, %159 : vector<2x96xf32>
    %162 = arith.divf %160, %161 : vector<2x96xf32>
    %163 = vector.extract_strided_slice %162 {offsets = [0, 0], sizes = [2, 32], strides = [1, 1]} : vector<2x96xf32> to vector<2x32xf32>
    %164 = vector.extract_strided_slice %162 {offsets = [0, 32], sizes = [2, 32], strides = [1, 1]} : vector<2x96xf32> to vector<2x32xf32>
    %165 = vector.extract_strided_slice %162 {offsets = [0, 64], sizes = [2, 32], strides = [1, 1]} : vector<2x96xf32> to vector<2x32xf32>
    %166 = vector.extract_strided_slice %156 {offsets = [0, 96], sizes = [2, 32], strides = [1, 1]} : vector<2x128xf32> to vector<2x32xf32>
    %167 = math.tanh %166 : vector<2x32xf32>
    %168 = arith.mulf %164, %107 : vector<2x32xf32>
    %169 = arith.mulf %163, %167 : vector<2x32xf32>
    %170 = arith.addf %168, %169 : vector<2x32xf32>
    %171 = math.tanh %170 : vector<2x32xf32>
    %172 = arith.mulf %165, %171 : vector<2x32xf32>
    %c8_i32_70 = arith.constant 8 : i32
    %173 = arith.cmpi slt, %148, %c8_i32_70 : i32
    %174 = arith.select %173, %172, %106 : vector<2x32xf32>
    %175 = arith.select %173, %170, %107 : vector<2x32xf32>
    %176 = arith.index_cast %c2_i32_60 : i32 to index
    %c0_71 = arith.constant 0 : index
    %c0_72 = arith.constant 0 : index
    %177 = vector.load %arg6[%176, %c0_71, %c0_72] : memref<3x2x32xf32, #tpu.memory_space<vmem>>, vector<1x2x32xf32>
    %178 = vector.shape_cast %177 : vector<1x2x32xf32> to vector<2x32xf32>
    %179 = vector.shape_cast %172 : vector<2x32xf32> to vector<1x2x32xf32>
    tpu.vector_store %arg6[%176, %c0_71, %c0_72], %179 {strides = array<i32>} : memref<3x2x32xf32, #tpu.memory_space<vmem>>, vector<1x2x32xf32>,
    %c2_i32_73 = arith.constant 2 : i32
    %180 = arith.subi %c2_i32_73, %c2_i32_60 : i32
    %c2_i32_74 = arith.constant 2 : i32
    %181 = arith.subi %c2_i32_74, %arg0 : i32
    %c3_i32_75 = arith.constant 3 : i32
    %182 = arith.muli %181, %c3_i32_75 : i32
    %183 = arith.addi %182, %180 : i32
    %c0_76 = arith.constant 0 : index
    %184 = arith.index_cast %180 : i32 to index
    %c0_77 = arith.constant 0 : index
    %c0_78 = arith.constant 0 : index
    %185 = vector.load %arg2[%c0_76, %184, %c0_77, %c0_78] : memref<1x3x2x128xbf16, #tpu.memory_space<vmem>>, vector<1x1x2x128xbf16>
    %186 = vector.shape_cast %185 : vector<1x1x2x128xbf16> to vector<2x128xbf16>
    %187 = arith.extf %186 : vector<2x128xbf16> to vector<2x128xf32>
    %c1_79 = arith.constant 1 : index
    %c0_80 = arith.constant 0 : index
    %c0_81 = arith.constant 0 : index
    %188 = vector.load %arg3[%c1_79, %c0_80, %c0_81] : memref<2x32x128xf32, #tpu.memory_space<vmem>>, vector<1x32x128xf32>
    %189 = vector.shape_cast %188 : vector<1x32x128xf32> to vector<32x128xf32>
    %cst_82 = arith.constant dense<0.000000e+00> : vector<2x128xf32>
    %190 = tpu.matmul %141, %189, %cst_82 {dimension_numbers = #tpu.dot_dimension_numbers<[1], [0], [0], [1], [0, 0, 1, 1], [], []>} : vector<2x32xf32>, vector<32x128xf32>, vector<2x128xf32> -> vector<2x128xf32>
    %191 = arith.addf %187, %190 : vector<2x128xf32>
    %192 = vector.extract_strided_slice %191 {offsets = [0, 0], sizes = [2, 96], strides = [1, 1]} : vector<2x128xf32> to vector<2x96xf32>
    %193 = arith.negf %192 : vector<2x96xf32>
    %194 = math.exp %193 : vector<2x96xf32>
    %cst_83 = arith.constant 1.000000e+00 : f32
    %195 = vector.broadcast %cst_83 : f32 to vector<2x96xf32>
    %196 = arith.addf %195, %194 : vector<2x96xf32>
    %197 = arith.divf %195, %196 : vector<2x96xf32>
    %198 = vector.extract_strided_slice %197 {offsets = [0, 0], sizes = [2, 32], strides = [1, 1]} : vector<2x96xf32> to vector<2x32xf32>
    %199 = vector.extract_strided_slice %197 {offsets = [0, 32], sizes = [2, 32], strides = [1, 1]} : vector<2x96xf32> to vector<2x32xf32>
    %200 = vector.extract_strided_slice %197 {offsets = [0, 64], sizes = [2, 32], strides = [1, 1]} : vector<2x96xf32> to vector<2x32xf32>
    %201 = vector.extract_strided_slice %191 {offsets = [0, 96], sizes = [2, 32], strides = [1, 1]} : vector<2x128xf32> to vector<2x32xf32>
    %202 = math.tanh %201 : vector<2x32xf32>
    %203 = arith.mulf %199, %142 : vector<2x32xf32>
    %204 = arith.mulf %198, %202 : vector<2x32xf32>
    %205 = arith.addf %203, %204 : vector<2x32xf32>
    %206 = math.tanh %205 : vector<2x32xf32>
    %207 = arith.mulf %200, %206 : vector<2x32xf32>
    %c8_i32_84 = arith.constant 8 : i32
    %208 = arith.cmpi slt, %183, %c8_i32_84 : i32
    %209 = arith.select %208, %207, %141 : vector<2x32xf32>
    %210 = arith.select %208, %205, %142 : vector<2x32xf32>
    %211 = arith.index_cast %180 : i32 to index
    %c0_85 = arith.constant 0 : index
    %c0_86 = arith.constant 0 : index
    %212 = vector.load %arg7[%211, %c0_85, %c0_86] : memref<3x2x32xf32, #tpu.memory_space<vmem>>, vector<1x2x32xf32>
    %213 = vector.shape_cast %212 : vector<1x2x32xf32> to vector<2x32xf32>
    %214 = vector.shape_cast %207 : vector<2x32xf32> to vector<1x2x32xf32>
    tpu.vector_store %arg7[%211, %c0_85, %c0_86], %214 {strides = array<i32>} : memref<3x2x32xf32, #tpu.memory_space<vmem>>, vector<1x2x32xf32>,
    %c3_i32_87 = arith.constant 3 : i32
    %c0_88 = arith.constant 0 : index
    %c0_89 = arith.constant 0 : index
    %c0_90 = arith.constant 0 : index
    %215 = vector.load %arg10[%c0_88, %c0_89, %c0_90] : memref<2x2x32xf32, #tpu.memory_space<vmem>>, vector<1x2x32xf32>
    %216 = vector.shape_cast %215 : vector<1x2x32xf32> to vector<2x32xf32>
    %217 = vector.shape_cast %174 : vector<2x32xf32> to vector<1x2x32xf32>
    tpu.vector_store %arg10[%c0_88, %c0_89, %c0_90], %217 {strides = array<i32>} : memref<2x2x32xf32, #tpu.memory_space<vmem>>, vector<1x2x32xf32>,
    %c0_91 = arith.constant 0 : index
    %c0_92 = arith.constant 0 : index
    %c0_93 = arith.constant 0 : index
    %218 = vector.load %arg11[%c0_91, %c0_92, %c0_93] : memref<2x2x32xf32, #tpu.memory_space<vmem>>, vector<1x2x32xf32>
    %219 = vector.shape_cast %218 : vector<1x2x32xf32> to vector<2x32xf32>
    %220 = vector.shape_cast %175 : vector<2x32xf32> to vector<1x2x32xf32>
    tpu.vector_store %arg11[%c0_91, %c0_92, %c0_93], %220 {strides = array<i32>} : memref<2x2x32xf32, #tpu.memory_space<vmem>>, vector<1x2x32xf32>,
    %c1_94 = arith.constant 1 : index
    %c0_95 = arith.constant 0 : index
    %c0_96 = arith.constant 0 : index
    %221 = vector.load %arg10[%c1_94, %c0_95, %c0_96] : memref<2x2x32xf32, #tpu.memory_space<vmem>>, vector<1x2x32xf32>
    %222 = vector.shape_cast %221 : vector<1x2x32xf32> to vector<2x32xf32>
    %223 = vector.shape_cast %209 : vector<2x32xf32> to vector<1x2x32xf32>
    tpu.vector_store %arg10[%c1_94, %c0_95, %c0_96], %223 {strides = array<i32>} : memref<2x2x32xf32, #tpu.memory_space<vmem>>, vector<1x2x32xf32>,
    %c1_97 = arith.constant 1 : index
    %c0_98 = arith.constant 0 : index
    %c0_99 = arith.constant 0 : index
    %224 = vector.load %arg11[%c1_97, %c0_98, %c0_99] : memref<2x2x32xf32, #tpu.memory_space<vmem>>, vector<1x2x32xf32>
    %225 = vector.shape_cast %224 : vector<1x2x32xf32> to vector<2x32xf32>
    %226 = vector.shape_cast %210 : vector<2x32xf32> to vector<1x2x32xf32>
    tpu.vector_store %arg11[%c1_97, %c0_98, %c0_99], %226 {strides = array<i32>} : memref<2x2x32xf32, #tpu.memory_space<vmem>>, vector<1x2x32xf32>,
    %c2_i32_100 = arith.constant 2 : i32
    %227 = arith.cmpi eq, %arg0, %c2_i32_100 : i32
    %228 = arith.extui %227 : i1 to i32
    %c0_i32_101 = arith.constant 0 : i32
    %229 = arith.cmpi ne, %228, %c0_i32_101 : i32
    scf.if %229 {
      %230 = vector.shape_cast %174 : vector<2x32xf32> to vector<1x2x32xf32>
      %231 = vector.shape_cast %209 : vector<2x32xf32> to vector<1x2x32xf32>
      %232 = tpu.concatenate %230, %231 in 0 : vector<1x2x32xf32>, vector<1x2x32xf32> -> vector<2x2x32xf32>
      %c0_102 = arith.constant 0 : index
      %c0_103 = arith.constant 0 : index
      %c0_104 = arith.constant 0 : index
      %233 = vector.load %arg8[%c0_102, %c0_103, %c0_104] : memref<2x2x32xf32, #tpu.memory_space<vmem>>, vector<2x2x32xf32>
      tpu.vector_store %arg8[%c0_102, %c0_103, %c0_104], %232 {strides = array<i32>} : memref<2x2x32xf32, #tpu.memory_space<vmem>>, vector<2x2x32xf32>,
      %234 = vector.shape_cast %175 : vector<2x32xf32> to vector<1x2x32xf32>
      %235 = vector.shape_cast %210 : vector<2x32xf32> to vector<1x2x32xf32>
      %236 = tpu.concatenate %234, %235 in 0 : vector<1x2x32xf32>, vector<1x2x32xf32> -> vector<2x2x32xf32>
      %c0_105 = arith.constant 0 : index
      %c0_106 = arith.constant 0 : index
      %c0_107 = arith.constant 0 : index
      %237 = vector.load %arg9[%c0_105, %c0_106, %c0_107] : memref<2x2x32xf32, #tpu.memory_space<vmem>>, vector<2x2x32xf32>
      tpu.vector_store %arg9[%c0_105, %c0_106, %c0_107], %236 {strides = array<i32>} : memref<2x2x32xf32, #tpu.memory_space<vmem>>, vector<2x2x32xf32>,
    } else {
    }
    return
  }
  func.func @transform_0(%arg0: i32) -> (i32, i32, i32, i32) {
    %c0_i32 = arith.constant 0 : i32
    %c0_i32_0 = arith.constant 0 : i32
    %c0_i32_1 = arith.constant 0 : i32
    %c0_i32_2 = arith.constant 0 : i32
    return %c0_i32, %arg0, %c0_i32_0, %c0_i32_1 : i32, i32, i32, i32
  }
  func.func @transform_1(%arg0: i32) -> (i32, i32, i32, i32) {
    %c2_i32 = arith.constant 2 : i32
    %0 = arith.subi %c2_i32, %arg0 : i32
    %c1_i32 = arith.constant 1 : i32
    %c0_i32 = arith.constant 0 : i32
    %c0_i32_0 = arith.constant 0 : i32
    %c0_i32_1 = arith.constant 0 : i32
    return %c1_i32, %0, %c0_i32, %c0_i32_0 : i32, i32, i32, i32
  }
  func.func @transform_2(%arg0: i32) -> (i32, i32, i32) {
    %c0_i32 = arith.constant 0 : i32
    %c0_i32_0 = arith.constant 0 : i32
    %c0_i32_1 = arith.constant 0 : i32
    %c0_i32_2 = arith.constant 0 : i32
    return %c0_i32, %c0_i32_0, %c0_i32_1 : i32, i32, i32
  }
  func.func @transform_3(%arg0: i32) -> (i32, i32, i32) {
    %c0_i32 = arith.constant 0 : i32
    %c0_i32_0 = arith.constant 0 : i32
    %c0_i32_1 = arith.constant 0 : i32
    %c0_i32_2 = arith.constant 0 : i32
    return %c0_i32, %c0_i32_0, %c0_i32_1 : i32, i32, i32
  }
  func.func @transform_4(%arg0: i32) -> (i32, i32, i32) {
    %c0_i32 = arith.constant 0 : i32
    %c0_i32_0 = arith.constant 0 : i32
    %c0_i32_1 = arith.constant 0 : i32
    %c0_i32_2 = arith.constant 0 : i32
    return %c0_i32, %c0_i32_0, %c0_i32_1 : i32, i32, i32
  }
  func.func @transform_5(%arg0: i32) -> (i32, i32, i32) {
    %c0_i32 = arith.constant 0 : i32
    %c0_i32_0 = arith.constant 0 : i32
    %c0_i32_1 = arith.constant 0 : i32
    return %arg0, %c0_i32, %c0_i32_0 : i32, i32, i32
  }
  func.func @transform_6(%arg0: i32) -> (i32, i32, i32) {
    %c2_i32 = arith.constant 2 : i32
    %0 = arith.subi %c2_i32, %arg0 : i32
    %c0_i32 = arith.constant 0 : i32
    %c0_i32_0 = arith.constant 0 : i32
    %c0_i32_1 = arith.constant 0 : i32
    return %0, %c0_i32, %c0_i32_0 : i32, i32, i32
  }
  func.func @transform_7(%arg0: i32) -> (i32, i32, i32) {
    %c0_i32 = arith.constant 0 : i32
    %c0_i32_0 = arith.constant 0 : i32
    %c0_i32_1 = arith.constant 0 : i32
    %c0_i32_2 = arith.constant 0 : i32
    return %c0_i32, %c0_i32_0, %c0_i32_1 : i32, i32, i32
  }
  func.func @transform_8(%arg0: i32) -> (i32, i32, i32) {
    %c0_i32 = arith.constant 0 : i32
    %c0_i32_0 = arith.constant 0 : i32
    %c0_i32_1 = arith.constant 0 : i32
    %c0_i32_2 = arith.constant 0 : i32
    return %c0_i32, %c0_i32_0, %c0_i32_1 : i32, i32, i32
  }
}

</mosaic_0001>

<bundles_post_ra>
// kernel: tpu_custom_call.1
= control target key start
LH: loop header
LB: loop body
LE: loop exit
PB: predicated region body
PF: predicated region fallthrough
CT: control target
= control target key end

     0   :  { %6 = vsyncpa [#allocation3], 0  ;;  %s286_s0 = inlined_call_operand.hbm [shape: f32[8,128], index: 0, kind: input, shape index: {}]   ;;  %s287_s1 = inlined_call_operand.hbm [shape: f32[8,128], index: 1, kind: output, shape index: {}]  }
   0x1   :  { %7 = vsyncpa [#allocation4], 0  ;;  %s269_s6 = smov 0  }
   0x2 LB: > { %s148_s7 = sadd.s32 4294967295, %s255_s6   ;;  %p149_p0 = scmp.ge.s32.totalorder %s255_s6, 1  ;;  %s255_s6 = sphi %s269_s6, %s13_s6  }
   0x3   : > { %p60_p1 = scmp.lt.s32.totalorder %s255_s6, 3  ;;  %s72_s10 = sshll.u32 %s286_s0, 4  ;;  %s73_s10 = int_to_ptr.hbm [resolvable:$true] %s72_s10 }
   0x4   : > { %p169_p3 = scmp.eq.s32.totalorder %s148_s7, 0  ;;  %s257_s11 = smov [#allocation2]  }
   0x5   : > { %p61_p2 = pnand %p149_p0, %p60_p1  ;;  %s74_s12 = sshll.u32 %s257_s11, 4  ;;  %s75_s12 = int_to_ptr.vmem [resolvable:$true] %s74_s12 }
   0x7   : > { %p165_p4 = pneg %p61_p2  ;;  %87 = sbr.rel (%p61_p2) target bundleno = 19 (0x13), region = 24 }
   0x9   : > { %p166_p5 = pnand %p169_p3, %p165_p4 }
   0xb   : > { %168 = dma.hbm_to_vmem [thread:$0]  (!%p166_p5), %s73_s10, 128, %s75_s12, [#allocation3]  }
   0xc   : > { %246 = dma.done.wait (%p169_p3), [#allocation3], 128  }
   0xd   : > { %248 = vsyncadd (%p169_p3), [#allocation3], 4294967168  ;;  %s258_s13 = smov [#allocation5]   ;;  %s108_s17 = sshll.u32 %s287_s1, 4  ;;  %v98_v0 = vld [vmem:[#allocation2] sm:$0xff]  ;;  %s109_s17 = int_to_ptr.hbm [resolvable:$true] %s108_s17 }
   0xe   : > { %s106_s14 = sshll.u32 %s258_s13, 4  ;;  %p171_p6 = scmp.eq.s32.totalorder %s148_s7, 1  ;;  %99 = vst [vmem:[#allocation5] sm:$0xff] %v98_v0  ;;  %s107_s14 = int_to_ptr.vmem [resolvable:$true] %s106_s14 }
  0x10   : > { %162 = dma.vmem_to_hbm [thread:$0]  (%p171_p6), %s107_s14, 128, %s109_s17, [#allocation4]  }
  0x11   : > { %250 = dma.done.wait (%p171_p6), [#allocation4], 128  }
  0x12   : > { %252 = vsyncadd (%p171_p6), [#allocation4], 4294967168 }
  0x13 PF: > { %s13_s6 = sadd.s32 1, %s255_s6  }
  0x14   : > { %p10_p7 = scmp.ge.s32.totalorder %s13_s6, 4  }
  0x16   :  { %12 = sbr.rel (!%p10_p7) target bundleno = 2 (0x2), region = 53 }
  0x1b   :  { %122 = vsyncpa [#allocation3], 1 }
  0x1c   :  { %124 = vsyncpa [#allocation3 + $0x1], 1 }
  0x1d   :  { %125 = vsyncpa [#allocation4], 1 }
  0x1e   :  { %127 = vsyncpa [#allocation4 + $0x1], 1 }

// kernel: lstm_frame_forward.2
= control target key start
LH: loop header
LB: loop body
LE: loop exit
PB: predicated region body
PF: predicated region fallthrough
CT: control target
= control target key end

     0   :  { %s1232_s27 = smov 0   ;;  %s1489_s0 = inlined_call_operand.vmem [shape: bf16[2,9,2,128], index: 0, kind: input, shape index: {}, may-alias: {0,1}]   ;;  %s1490_s1 = inlined_call_operand.vmem [shape: bf16[2,9,2,128], index: 1, kind: input, shape index: {}, may-alias: {0,1}]   ;;  %s1491_s2 = inlined_call_operand.vmem [shape: f32[2,32,128], index: 2, kind: input, shape index: {}]   ;;  %s1492_s3 = inlined_call_operand.vmem [shape: f32[2,2,32], index: 3, kind: input, shape index: {}, may-alias: {3,4}]   ;;  %s1493_s4 = inlined_call_operand.vmem [shape: f32[2,2,32], index: 4, kind: input, shape index: {}, may-alias: {3,4}]   ;;  %s1494_s5 = inlined_call_operand.vmem [shape: f32[9,2,32], index: 5, kind: output, shape index: {0}]   ;;  %s1495_s6 = inlined_call_operand.vmem [shape: f32[9,2,32], index: 6, kind: output, shape index: {1}]   ;;  %s1496_s7 = inlined_call_operand.vmem [shape: f32[2,2,32], index: 7, kind: output, shape index: {2}]   ;;  %s1497_s8 = inlined_call_operand.vmem [shape: f32[2,2,32], index: 8, kind: output, shape index: {3}]  }
   0x1 LB: > { %s1238_s28 = sadd.s32 4294967295, %s1180_s27   ;;  %p1073_p0 = scmp.ge.s32.totalorder %s1180_s27, 1  ;;  %s1180_s27 = sphi %s1232_s27, %s19_s27  }
   0x2   : > { %p276_p1 = scmp.lt.s32.totalorder %s1180_s27, 4 }
   0x4   : > { %p277_p2 = pnand %p1073_p0, %p276_p1 }
   0x5   : > { %s1243_s29 = smul.u32 (!%p277_p2), 3, %s1238_s28  ;;  %s326_s30 = ssub.s32 (!%p277_p2), 2, %s1238_s28 }
   0x6   : > { %280 = sbr.rel (%p277_p2) target bundleno = 3210 (0xc8a), region = 40  ;;  %p1076_p5 = scmp.ne.s32.totalorder (!%p277_p2), %s1238_s28, 0 }
   0x7   : > { %s1246_s9 = smul.u32 (!%p277_p2), 3, %s326_s30  ;;  %p322_p3 = scmp.lt.s32.totalorder (!%p277_p2), %s1243_s29, 8 }
   0x9   : > { %p328_p4 = scmp.lt.s32.totalorder (!%p277_p2), %s1246_s9, 8 }
   0xb   : > { %s323_s10 = scalar_select %p322_p3, %s1243_s29, 8 }
   0xc   : > { %s329_s11 = scalar_select %p328_p4, %s1246_s9, 8 }
   0xd   : > { %s1259_s14 = scalar_lea.vmem %s1489_s0, %s323_s10  ;;  %s1074_s15 = sshll.u32 %s323_s10, 1 }
   0xe   : > { %s1264_s18 = scalar_lea.vmem %s1490_s1, %s329_s11  ;;  %s1269_s21 = scalar_lea.vmem %s1494_s5, %s1074_s15 }
   0xf   : > { %s1075_s22 = sshll.u32 %s329_s11, 1  ;;  %351 = sbr.rel (%p1076_p5) target bundleno = 25 (0x19), region = 44 }
  0x10   : > { %s1274_s25 = scalar_lea.vmem %s1495_s6, %s1075_s22 }
  0x14   : > { %v352_v0 = vld [vmem:[%s1492_s3] sm:$0x3]  ;;  %vm354_vm0 = vcmask 254976   ;;  %v353_v1 = vld [vmem:[%s1492_s3 + $0x2] sm:$0x3] }
  0x15   : > { %355 = vst.msk [vmem:[#allocation2] sm:$0x3] %vm354_vm0, %v352_v0  ;;  %v357_v2 = vld [vmem:[%s1493_s4] sm:$0x3]  ;;  %v358_v3 = vld [vmem:[%s1493_s4 + $0x2] sm:$0x3] }
  0x16   : > { %356 = vst.msk [vmem:[#allocation2 + $0x2] sm:$0x3] %vm354_vm0, %v353_v1 }
  0x17   : > { %359 = vst.msk [vmem:[#allocation3] sm:$0x3] %vm354_vm0, %v357_v2 }
  0x18   : > { %360 = vst.msk [vmem:[#allocation3 + $0x2] sm:$0x3] %vm354_vm0, %v358_v3 }
  0x19 PF: > { %v373_v4 = vld [vmem:[%s1491_s2 + $0x18] sm:$0xff]  ;;  %v372_v5 = vld [vmem:[%s1491_s2 + $0x10] sm:$0xff]  ;;  %v371_v7 = vld [vmem:[%s1491_s2 + $0x8] sm:$0xff]  ;;  %s1182_s17 = smov 32   ;;  %vm374_vm1 = vcmask 261120   ;;  %s1183_s22 = smov 64  }
  0x1a   : > { %390 = vmatpush.msra.mxu0 %v373_v4  ;;  %v1083_v6 = vld [vmem:[%s1491_s2 + $0x38] sm:$0xff]  ;;  %577 = vmatpush.msra.mxu2 %v373_v4  ;;  %v1082_v8 = vld [vmem:[%s1491_s2 + $0x30] sm:$0xff]  ;;  %v1081_v9 = vld [vmem:[%s1491_s2 + $0x28] sm:$0xff]  ;;  %s441_s23 = scalar_select %p322_p3, 1, 0 }
  0x1b   : > { %483 = vmatpush.msra.mxu1 %v1083_v6  ;;  %664 = vmatpush.msra.mxu3 %v1083_v6  ;;  %v370_v12 = vld [vmem:[%s1491_s2] sm:$0xff]  ;;  %v1079_v18 = vld [vmem:[%s1264_s18 + $0xb] sm:$0x1]  ;;  %s459_s24 = sadd.s32 2, %s1246_s9  ;;  %s550_s30 = sadd.s32 1, %s1243_s29 }
  0x1c   : > { %391 = vmatpush.msra.mxu0 %v372_v5  ;;  %578 = vmatpush.msra.mxu2 %v372_v5  ;;  %v1311_v13 = vld [vmem:[#allocation2] sm:$0x3]  ;;  %v1080_v14 = vld [vmem:[%s1491_s2 + $0x20] sm:$0xff]  ;;  %v462_v21 = vunpack.c.l.bf16 %v1079_v18  ;;  %p533_p6 = scmp.lt.s32.totalorder %s459_s24, 8  ;;  %p623_p7 = scmp.lt.s32.totalorder %s550_s30, 8 }
  0x1d   : > { %484 = vmatpush.msra.mxu1 %v1082_v8  ;;  %v1317_v15 = vld [vmem:[#allocation2 + $0x2] sm:$0x3]  ;;  %665 = vmatpush.msra.mxu3 %v1082_v8  ;;  %v368_v16 = vld [vmem:[%s1259_s14] sm:$0x1]  ;;  %p1110_p10 = scmp.ne.s32.totalorder %s1238_s28, 2 }
  0x1e   : > { %v364_v10 = vld [vmem:[#allocation3] sm:$0x3]  ;;  %392 = vmatpush.msra.mxu0 %v371_v7  ;;  %579 = vmatpush.msra.mxu2 %v371_v7  ;;  %v369_v17 = vunpack.c.l.bf16 %v368_v16  ;;  %s534_s26 = scalar_select %p533_p6, 1, 0 }
  0x1f   : > { %v366_v11 = vld [vmem:[#allocation3 + $0x2] sm:$0x3]  ;;  %420 = vrot.lane.b32.xlu1 %v364_v10, %s1182_s17  ;;  %485 = vmatpush.msra.mxu1 %v1081_v9  ;;  %s624_s10 = scalar_select %p623_p7, 1, 0 }
  0x20   : > { %513 = vrot.lane.b32.xlu2 %v366_v11, %s1182_s17  ;;  %393 = vmatpush.msra.mxu0 %v370_v12 }
  0x21   : > { %1077 = vmatmul.msk.f32.vlgmr.msra.gmra.mxu0 %vm374_vm1, %v1311_v13  ;;  %486 = vmatpush.msra.mxu1 %v1080_v14 }
  0x22   : > { %1084 = vmatmul.msk.f32.vlgmr.msra.gmra.mxu1 %vm374_vm1, %v1317_v15  ;;  %580 = vmatpush.msra.mxu2 %v370_v12 }
  0x23   : > { %666 = vmatpush.msra.mxu3 %v1081_v9  ;;  %751 = vmatpush.msrb.mxu0 %v373_v4 }
  0x24   : > { %836 = vmatpush.msrb.mxu1 %v1083_v6 }
  0x25   : > { %667 = vmatpush.msra.mxu3 %v1080_v14  ;;  %752 = vmatpush.msrb.mxu0 %v372_v5 }
  0x26   : > { %837 = vmatpush.msrb.mxu1 %v1082_v8 }
  0x27   : > { %753 = vmatpush.msrb.mxu0 %v371_v7  ;;  %v442_v7 = vstv %s441_s23 }
  0x28   : > { %838 = vmatpush.msrb.mxu1 %v1081_v9  ;;  %vm1343_vm10 = vcmp.eq.s32.totalorder %v442_v7, 1 }
  0x29   : > { %754 = vmatpush.msrb.mxu0 %v370_v12 }
  0x2a   : > { %839 = vmatpush.msrb.mxu1 %v1080_v14  ;;  %v1087_v14 = vld [vmem:[%s1259_s14 + $0x1] sm:$0x1] }
  0x2b   : > { %v553_v16 = vunpack.c.l.bf16 %v1087_v14 }
  0x7a   : > { %v1331_v56 = vpop.permute.xlu2 %513 }
  0x91   : > { %v421_v60 = vpop.permute.xlu1 %420 }
  0x9e   : > { %v395_v19 = vpop.f32.mrf.mxu0 }
  0x9f   : > { %v398_v20 = vadd.f32 %v395_v19, %v369_v17  ;;  %v488_v22 = vpop.f32.mrf.mxu1 }
  0xa0   : > { %v491_v23 = vadd.f32 %v488_v22, %v462_v21 }
  0xa1   : > { %1126 = vtanh.f32 %v398_v20  ;;  %v1078_v26 = vmul.f32 -1.442695, %v398_v20 }
  0xa2   : > { %1128 = vtanh.f32 %v491_v23  ;;  %v1085_v27 = vmul.f32 -1.442695, %v491_v23 }
  0xa3   : > { %1130 = vpow2.f32 %v1078_v26 }
  0xa4   : > { %1132 = vpow2.f32 %v1085_v27 }
  0xa7   : > { %v1127_v24 = vpop.eup %1126 }
  0xa8   : > { %425 = vrot.lane.b32.xlu0 %v1127_v24, %s1182_s17  ;;  %v1129_v25 = vpop.eup %1128 }
  0xa9   : > { %v1131_v28 = vpop.eup %1130 }
  0xaa   : > { %v402_v29 = vadd.f32 1.0, %v1131_v28  ;;  %v1133_v30 = vpop.eup %1132 }
  0xab   : > { %v495_v31 = vadd.f32 1.0, %v1133_v30 }
  0xac   : > { %1134 = vrcp.f32 %v402_v29  ;;  %v414_v40 = vand.u32 2147483648, %v402_v29  ;;  %vm408_vm3 = vweird.f32 %v402_v29  ;;  %v412_v41 = vand.u32 2147483647, %v402_v29 }
  0xad   : > { %1136 = vrcp.f32 %v495_v31  ;;  %vm501_vm6 = vweird.f32 %v495_v31  ;;  %v507_v46 = vand.u32 2147483648, %v495_v31  ;;  %v505_v49 = vand.u32 2147483647, %v495_v31 }
  0xae   : > { %v415_v44 = vor.u32 1.1754944e-38, %v414_v40  ;;  %vm413_vm5 = vcmp.eq.f32.partialorder %v412_v41, 8.507059e+37  ;;  %v535_v41 = vstv %s534_s26 }
  0xaf   : > { %v508_v51 = vor.u32 1.1754944e-38, %v507_v46  ;;  %vm506_vm9 = vcmp.eq.f32.partialorder %v505_v49, 8.507059e+37  ;;  %vm536_vm15 = vcmp.eq.s32.totalorder %v535_v41, 1 }
  0xb0   : > { %518 = vrot.lane.b32.xlu0 %v1129_v25, %s1182_s17 }
  0xb2   : > { %v1135_v32 = vpop.eup %1134 }
  0xb3   : > { %v404_v33 = vmul.f32 %v1135_v32, %v402_v29  ;;  %v1137_v35 = vpop.eup %1136  ;;  %vm409_vm2 = vweird.f32 %v1135_v32 }
  0xb4   : > { %v497_v37 = vmul.f32 %v1137_v35, %v495_v31  ;;  %vm410_vm4 = vmor %vm408_vm3, %vm409_vm2  ;;  %vm502_vm7 = vweird.f32 %v1137_v35 }
  0xb5   : > { %v405_v34 = vsub.f32 1.0, %v404_v33  ;;  %vm503_vm8 = vmor %vm501_vm6, %vm502_vm7 }
  0xb6   : > { %v498_v39 = vsub.f32 1.0, %v497_v37 }
  0xb7   : > { %v406_v36 = vmul.f32 %v1135_v32, %v405_v34 }
  0xb8   : > { %v499_v43 = vmul.f32 %v1137_v35, %v498_v39 }
  0xb9   : > { %v407_v38 = vadd.f32 %v1135_v32, %v406_v36 }
  0xba   : > { %v500_v48 = vadd.f32 %v1137_v35, %v499_v43 }
  0xbb   : > { %v411_v42 = vsel %vm410_vm4, %v1135_v32, %v407_v38 }
  0xbc   : > { %v416_v45 = vsel %vm413_vm5, %v415_v44, %v411_v42  ;;  %v504_v52 = vsel %vm503_vm8, %v1137_v35, %v500_v48 }
  0xbd   : > { %v509_v53 = vsel %vm506_vm9, %v508_v51, %v504_v52  ;;  %v423_v62 = vmul.f32 %v421_v60, %v416_v45 }
  0xbe   : > { %v516_v57 = vmul.f32 %v1331_v56, %v509_v53 }
 0x11a   : > { %v426_v47 = vpop.permute.xlu0 %425 }
 0x11b   : > { %v428_v50 = vmul.f32 %v426_v47, %v416_v45  ;;  %v1091_v47 = vld [vmem:[%s1264_s18 + $0xa] sm:$0x1] }
 0x11c   : > { %v640_v48 = vunpack.c.l.bf16 %v1091_v47 }
 0x11d   : > { %430 = vrot.lane.b32.xlu1 %v428_v50, %s1182_s17 }
 0x122   : > { %v519_v54 = vpop.permute.xlu0 %518 }
 0x123   : > { %v521_v55 = vmul.f32 %v519_v54, %v509_v53 }
 0x125   : > { %523 = vrot.lane.b32.xlu2 %v521_v55, %s1182_s17 }
 0x12d   : > { %444 = vrot.lane.b32.xlu2 %v1311_v13, %s1183_s22 }
 0x17f   : > { %v524_v58 = vpop.permute.xlu2 %523 }
 0x180   : > { %v1334_v59 = vadd.f32 %v524_v58, %v516_v57 }
 0x182   : > { %1138 = vtanh.f32 %v1334_v59 }
 0x187   : > { %v445_v8 = vpop.permute.xlu2 %444 }
 0x188   : > { %v1139_v61 = vpop.eup %1138 }
 0x189   : > { %529 = vrot.lane.b32.xlu1 %v1139_v61, %s1182_s17 }
 0x18f   : > { %v431_v63 = vpop.permute.xlu1 %430 }
 0x190   : > { %v433_v0 = vadd.f32 %v431_v63, %v423_v62 }
 0x192   : > { %1140 = vtanh.f32 %v433_v0  ;;  %v1363_v34 = vsel %vm1343_vm10, %v433_v0, %v421_v60 }
 0x198   : > { %v1141_v1 = vpop.eup %1140 }
 0x199   : > { %436 = vrot.lane.b32.xlu0 %v1141_v1, %s1182_s17 }
 0x1fb   : > { %v530_v4 = vpop.permute.xlu1 %529 }
 0x1fc   : > { %v532_v5 = vmul.f32 %v530_v4, %v509_v53 }
 0x20b   : > { %v437_v2 = vpop.permute.xlu0 %436 }
 0x20c   : > { %v439_v3 = vmul.f32 %v437_v2, %v416_v45 }
 0x20e   : > { %450 = vst [vmem:[#allocation1] ss:$4 sm:$0xff] %v439_v3  ;;  %v1351_v11 = vsel %vm1343_vm10, %v439_v3, %v445_v8 }
 0x215   : > { %v1339_v6 = vld.sshfl [vmem:[#allocation1] sm:$0xff pattern:$0x73625140] }
 0x216   : > { %543 = vst [vmem:[#allocation1] ss:$4 sm:$0xff] %v532_v5 }
 0x21d   : > { %v1347_v10 = vld.sshfl [vmem:[#allocation1] sm:$0xff pattern:$0x73625140] }
 0x21e   : > { %559 = vst [vmem:[#allocation1] ss:$4 sm:$0xff] %v1351_v11 }
 0x225   : > { %v560_v12 = vld.sshfl [vmem:[#allocation1] sm:$0xff pattern:$0x73625140] }
 0x226   : > { %561 = vrot.lane.b32.xlu0 %v560_v12, %s1183_s22 }
 0x298   : > { %v562_v13 = vpop.permute.xlu0 %561 }
 0x299   : > { %1088 = vmatmul.msk.f32.vlgmr.msra.gmra.mxu2 %vm374_vm1, %v562_v13 }
 0x31c   : > { %v582_v17 = vpop.f32.mrf.mxu2 }
 0x31d   : > { %v585_v18 = vadd.f32 %v582_v17, %v553_v16  ;;  %v625_v16 = vstv %s624_s10 }
 0x31e   : > { %vm626_vm5 = vcmp.eq.s32.totalorder %v625_v16, 1 }
 0x31f   : > { %1142 = vtanh.f32 %v585_v18  ;;  %v1089_v20 = vmul.f32 -1.442695, %v585_v18 }
 0x321   : > { %1144 = vpow2.f32 %v1089_v20 }
 0x325   : > { %v1143_v19 = vpop.eup %1142 }
 0x326   : > { %608 = vrot.lane.b32.xlu1 %v1143_v19, %s1182_s17  ;;  %v1099_v19 = vld [vmem:[%s1259_s14 + $0x2] sm:$0x1]  ;;  %s637_s14 = sadd.s32 1, %s1246_s9  ;;  %s1185_s9 = smov (!%p1110_p10), 64  }
 0x327   : > { %v1145_v21 = vpop.eup %1144  ;;  %v727_v20 = vunpack.c.l.bf16 %v1099_v19  ;;  %p710_p8 = scmp.lt.s32.totalorder %s637_s14, 8 }
 0x328   : > { %v589_v22 = vadd.f32 1.0, %v1145_v21 }
 0x329   : > { %s711_s12 = scalar_select %p710_p8, 1, 0 }
 0x32a   : > { %1146 = vrcp.f32 %v589_v22  ;;  %v601_v28 = vand.u32 2147483648, %v589_v22  ;;  %vm595_vm12 = vweird.f32 %v589_v22  ;;  %v599_v29 = vand.u32 2147483647, %v589_v22 }
 0x32c   : > { %v602_v31 = vor.u32 1.1754944e-38, %v601_v28  ;;  %vm600_vm14 = vcmp.eq.f32.partialorder %v599_v29, 8.507059e+37 }
 0x32e   : > { %537 = vrot.lane.b32.xlu1 %v1317_v15, %s1183_s22 }
 0x330   : > { %v1147_v23 = vpop.eup %1146 }
 0x331   : > { %v591_v24 = vmul.f32 %v1147_v23, %v589_v22  ;;  %vm596_vm11 = vweird.f32 %v1147_v23 }
 0x332   : > { %vm597_vm13 = vmor %vm595_vm12, %vm596_vm11 }
 0x333   : > { %v592_v25 = vsub.f32 1.0, %v591_v24 }
 0x335   : > { %v593_v26 = vmul.f32 %v1147_v23, %v592_v25 }
 0x337   : > { %v594_v27 = vadd.f32 %v1147_v23, %v593_v26 }
 0x339   : > { %v598_v30 = vsel %vm597_vm13, %v1147_v23, %v594_v27 }
 0x33a   : > { %v603_v32 = vsel %vm600_vm14, %v602_v31, %v598_v30  ;;  %vm455_vm14 = vcmask 254976  }
 0x33b   : > { %v606_v35 = vmul.f32 %v603_v32, %v1363_v34 }
 0x398   : > { %v609_v15 = vpop.permute.xlu1 %608 }
 0x399   : > { %v611_v33 = vmul.f32 %v609_v15, %v603_v32 }
 0x39b   : > { %613 = vrot.lane.b32.xlu2 %v611_v33, %s1182_s17 }
 0x3a0   : > { %v538_v42 = vpop.permute.xlu1 %537 }
 0x3a1   : > { %v1372_v43 = vsel %vm536_vm15, %v532_v5, %v538_v42  ;;  %v1385_v5 = vsel %vm536_vm15, %v1334_v59, %v1331_v56 }
 0x3f5   : > { %v614_v36 = vpop.permute.xlu2 %613 }
 0x3f6   : > { %v1366_v37 = vadd.f32 %v614_v36, %v606_v35 }
 0x3f8   : > { %1148 = vtanh.f32 %v1366_v37 }
 0x3fe   : > { %v1149_v38 = vpop.eup %1148 }
 0x3ff   : > { %619 = vrot.lane.b32.xlu0 %v1149_v38, %s1182_s17 }
 0x471   : > { %v620_v39 = vpop.permute.xlu0 %619 }
 0x472   : > { %v622_v40 = vmul.f32 %v620_v39, %v603_v32  ;;  %v1408_v39 = vsel %vm626_vm5, %v1366_v37, %v1363_v34  ;;  %v712_v34 = vstv %s711_s12 }
 0x473   : > { %vm713_vm10 = vcmp.eq.s32.totalorder %v712_v34, 1 }
 0x474   : > { %630 = vst [vmem:[#allocation1] ss:$4 sm:$0xff] %v622_v40  ;;  %v1395_v56 = vsel %vm626_vm5, %v622_v40, %v1351_v11 }
 0x47b   : > { %v1374_v44 = vld.sshfl [vmem:[#allocation1] sm:$0xff pattern:$0x73625140] }
 0x47c   : > { %646 = vst [vmem:[#allocation1] ss:$4 sm:$0xff] %v1372_v43 }
 0x483   : > { %v647_v45 = vld.sshfl [vmem:[#allocation1] sm:$0xff pattern:$0x73625140] }
 0x484   : > { %648 = vrot.lane.b32.xlu2 %v647_v45, %s1183_s22 }
 0x4de   : > { %v649_v46 = vpop.permute.xlu2 %648 }
 0x4df   : > { %1096 = vmatmul.msk.f32.vlgmr.msra.gmra.mxu3 %vm374_vm1, %v649_v46 }
 0x562   : > { %v669_v49 = vpop.f32.mrf.mxu3 }
 0x563   : > { %v672_v50 = vadd.f32 %v669_v49, %v640_v48 }
 0x565   : > { %1150 = vtanh.f32 %v672_v50  ;;  %v1097_v52 = vmul.f32 -1.442695, %v672_v50 }
 0x567   : > { %1152 = vpow2.f32 %v1097_v52 }
 0x56b   : > { %v1151_v51 = vpop.eup %1150 }
 0x56c   : > { %695 = vrot.lane.b32.xlu0 %v1151_v51, %s1182_s17  ;;  %v1103_v51 = vld [vmem:[%s1264_s18 + $0x9] sm:$0x1]  ;;  %s724_s18 = sadd.s32 2, %s1243_s29 }
 0x56d   : > { %v1153_v53 = vpop.eup %1152  ;;  %v812_v52 = vunpack.c.l.bf16 %v1103_v51  ;;  %p797_p9 = scmp.lt.s32.totalorder %s724_s18, 8 }
 0x56e   : > { %v676_v54 = vadd.f32 1.0, %v1153_v53  ;;  %s883_s29 = scalar_select %p328_p4, 1, 0 }
 0x56f   : > { %s798_s13 = scalar_select %p797_p9, 1, 0 }
 0x570   : > { %1154 = vrcp.f32 %v676_v54  ;;  %v688_v62 = vand.u32 2147483648, %v676_v54  ;;  %vm682_vm2 = vweird.f32 %v676_v54  ;;  %v686_v63 = vand.u32 2147483647, %v676_v54 }
 0x572   : > { %v689_v1 = vor.u32 1.1754944e-38, %v688_v62  ;;  %vm687_vm4 = vcmp.eq.f32.partialorder %v686_v63, 8.507059e+37 }
 0x576   : > { %v1155_v55 = vpop.eup %1154 }
 0x577   : > { %v678_v57 = vmul.f32 %v1155_v55, %v676_v54  ;;  %vm683_vm0 = vweird.f32 %v1155_v55 }
 0x578   : > { %vm684_vm3 = vmor %vm682_vm2, %vm683_vm0 }
 0x579   : > { %v679_v58 = vsub.f32 1.0, %v678_v57 }
 0x57b   : > { %v680_v60 = vmul.f32 %v1155_v55, %v679_v58 }
 0x57d   : > { %v681_v61 = vadd.f32 %v1155_v55, %v680_v60 }
 0x57f   : > { %v685_v0 = vsel %vm684_vm3, %v1155_v55, %v681_v61 }
 0x580   : > { %v690_v3 = vsel %vm687_vm4, %v689_v1, %v685_v0 }
 0x581   : > { %v693_v7 = vmul.f32 %v690_v3, %v1385_v5 }
 0x5de   : > { %v696_v2 = vpop.permute.xlu0 %695 }
 0x5df   : > { %v698_v4 = vmul.f32 %v696_v2, %v690_v3 }
 0x5e1   : > { %700 = vrot.lane.b32.xlu1 %v698_v4, %s1182_s17 }
 0x653   : > { %v701_v8 = vpop.permute.xlu1 %700 }
 0x654   : > { %v1388_v9 = vadd.f32 %v701_v8, %v693_v7 }
 0x656   : > { %1156 = vtanh.f32 %v1388_v9 }
 0x65c   : > { %v1157_v12 = vpop.eup %1156 }
 0x65d   : > { %706 = vrot.lane.b32.xlu2 %v1157_v12, %s1182_s17 }
 0x6b7   : > { %v707_v13 = vpop.permute.xlu2 %706 }
 0x6b8   : > { %v709_v14 = vmul.f32 %v707_v13, %v690_v3 }
 0x6ba   : > { %717 = vst [vmem:[#allocation1] ss:$4 sm:$0xff] %v709_v14  ;;  %v1421_v37 = vsel %vm713_vm10, %v709_v14, %v1372_v43  ;;  %v715_v14 = vsel %vm713_vm10, %v1388_v9, %v1385_v5 }
 0x6c1   : > { %v1397_v59 = vld.sshfl [vmem:[#allocation1] sm:$0xff pattern:$0x73625140] }
 0x6c2   : > { %733 = vst [vmem:[#allocation1] ss:$4 sm:$0xff] %v1395_v56 }
 0x6c9   : > { %v734_v17 = vld.sshfl [vmem:[#allocation1] sm:$0xff pattern:$0x73625140] }
 0x6ca   : > { %735 = vrot.lane.b32.xlu0 %v734_v17, %s1183_s22 }
 0x73c   : > { %v736_v18 = vpop.permute.xlu0 %735 }
 0x73d   : > { %1100 = vmatmul.msk.f32.vlgmr.msrb.gmra.mxu0 %vm374_vm1, %v736_v18 }
 0x7ba   : > { %v756_v21 = vpop.f32.mrf.mxu0 }
 0x7bb   : > { %v759_v22 = vadd.f32 %v756_v21, %v727_v20  ;;  %v799_v20 = vstv %s798_s13 }
 0x7bc   : > { %vm800_vm15 = vcmp.eq.s32.totalorder %v799_v20, 1 }
 0x7bd   : > { %1158 = vtanh.f32 %v759_v22  ;;  %v1101_v11 = vmul.f32 -1.442695, %v759_v22 }
 0x7bf   : > { %1160 = vpow2.f32 %v1101_v11 }
 0x7c3   : > { %v1159_v23 = vpop.eup %1158 }
 0x7c4   : > { %782 = vrot.lane.b32.xlu1 %v1159_v23, %s1182_s17 }
 0x7c5   : > { %v1161_v24 = vpop.eup %1160 }
 0x7c6   : > { %v763_v25 = vadd.f32 1.0, %v1161_v24  ;;  %v884_v24 = vstv %s883_s29 }
 0x7c7   : > { %vm885_vm0 = vcmp.eq.s32.totalorder %v884_v24, 1 }
 0x7c8   : > { %1162 = vrcp.f32 %v763_v25  ;;  %v775_v31 = vand.u32 2147483648, %v763_v25  ;;  %vm769_vm7 = vweird.f32 %v763_v25  ;;  %v773_v15 = vand.u32 2147483647, %v763_v25 }
 0x7ca   : > { %v776_v33 = vor.u32 1.1754944e-38, %v775_v31  ;;  %vm774_vm9 = vcmp.eq.f32.partialorder %v773_v15, 8.507059e+37 }
 0x7ce   : > { %v1163_v26 = vpop.eup %1162 }
 0x7cf   : > { %v765_v27 = vmul.f32 %v1163_v26, %v763_v25  ;;  %vm770_vm6 = vweird.f32 %v1163_v26 }
 0x7d0   : > { %vm771_vm8 = vmor %vm769_vm7, %vm770_vm6 }
 0x7d1   : > { %v766_v28 = vsub.f32 1.0, %v765_v27 }
 0x7d3   : > { %v767_v29 = vmul.f32 %v1163_v26, %v766_v28 }
 0x7d5   : > { %v768_v30 = vadd.f32 %v1163_v26, %v767_v29 }
 0x7d7   : > { %v772_v32 = vsel %vm771_vm8, %v1163_v26, %v768_v30 }
 0x7d8   : > { %v777_v36 = vsel %vm774_vm9, %v776_v33, %v772_v32 }
 0x7d9   : > { %v780_v40 = vmul.f32 %v777_v36, %v1408_v39 }
 0x836   : > { %v783_v35 = vpop.permute.xlu1 %782 }
 0x837   : > { %v785_v38 = vmul.f32 %v783_v35, %v777_v36 }
 0x839   : > { %787 = vrot.lane.b32.xlu2 %v785_v38, %s1182_s17 }
 0x893   : > { %v788_v41 = vpop.permute.xlu2 %787 }
 0x894   : > { %v1411_v42 = vadd.f32 %v788_v41, %v780_v40 }
 0x896   : > { %1164 = vtanh.f32 %v1411_v42 }
 0x89c   : > { %v1165_v45 = vpop.eup %1164 }
 0x89d   : > { %793 = vrot.lane.b32.xlu0 %v1165_v45, %s1182_s17 }
 0x90f   : > { %v794_v46 = vpop.permute.xlu0 %793 }
 0x910   : > { %v1416_v47 = vmul.f32 %v794_v46, %v777_v36 }
 0x912   : > { %804 = vst [vmem:[#allocation1] ss:$4 sm:$0xff] %v1416_v47  ;;  %v801_v22 = vsel %vm800_vm15, %v1416_v47, %v1395_v56 }
 0x919   : > { %v805_v48 = vld.sshfl [vmem:[#allocation1] sm:$0xff pattern:$0x73625140] }
 0x91a   : > { %818 = vst [vmem:[#allocation1] ss:$4 sm:$0xff] %v1421_v37 }
 0x921   : > { %v819_v49 = vld.sshfl [vmem:[#allocation1] sm:$0xff pattern:$0x73625140] }
 0x922   : > { %820 = vrot.lane.b32.xlu1 %v819_v49, %s1183_s22 }
 0x994   : > { %v821_v50 = vpop.permute.xlu1 %820 }
 0x995   : > { %1108 = vmatmul.msk.f32.vlgmr.msrb.gmra.mxu1 %vm374_vm1, %v821_v50 }
 0xa12   : > { %v841_v53 = vpop.f32.mrf.mxu1 }
 0xa13   : > { %v844_v54 = vadd.f32 %v841_v53, %v812_v52 }
 0xa15   : > { %1166 = vtanh.f32 %v844_v54  ;;  %v1109_v43 = vmul.f32 -1.442695, %v844_v54 }
 0xa17   : > { %1168 = vpow2.f32 %v1109_v43 }
 0xa1b   : > { %v1167_v55 = vpop.eup %1166 }
 0xa1c   : > { %867 = vrot.lane.b32.xlu2 %v1167_v55, %s1182_s17 }
 0xa1d   : > { %v1169_v57 = vpop.eup %1168 }
 0xa1e   : > { %v848_v58 = vadd.f32 1.0, %v1169_v57 }
 0xa20   : > { %1170 = vrcp.f32 %v848_v58  ;;  %v860_v1 = vand.u32 2147483648, %v848_v58  ;;  %vm854_vm11 = vweird.f32 %v848_v58  ;;  %v858_v2 = vand.u32 2147483647, %v848_v58 }
 0xa22   : > { %v861_v3 = vor.u32 1.1754944e-38, %v860_v1  ;;  %vm859_vm13 = vcmp.eq.f32.partialorder %v858_v2, 8.507059e+37 }
 0xa24   : > { %452 = vrot.lane.b32.xlu2 %v1339_v6, %s1183_s22 }
 0xa26   : > { %v1171_v60 = vpop.eup %1170 }
 0xa27   : > { %v850_v61 = vmul.f32 %v1171_v60, %v848_v58  ;;  %vm855_vm1 = vweird.f32 %v1171_v60 }
 0xa28   : > { %vm856_vm12 = vmor %vm854_vm11, %vm855_vm1 }
 0xa29   : > { %v851_v62 = vsub.f32 1.0, %v850_v61 }
 0xa2b   : > { %v852_v63 = vmul.f32 %v1171_v60, %v851_v62 }
 0xa2c   : > { %719 = vrot.lane.b32.xlu2 %v1397_v59, %s1183_s22 }
 0xa2d   : > { %v853_v0 = vadd.f32 %v1171_v60, %v852_v63 }
 0xa2f   : > { %v857_v6 = vsel %vm856_vm12, %v1171_v60, %v853_v0 }
 0xa30   : > { %v862_v7 = vsel %vm859_vm13, %v861_v3, %v857_v6 }
 0xa31   : > { %v865_v16 = vmul.f32 %v862_v7, %v715_v14 }
 0xa76   : > { %v868_v4 = vpop.permute.xlu2 %867 }
 0xa77   : > { %v870_v8 = vmul.f32 %v868_v4, %v862_v7 }
 0xa79   : > { %872 = vrot.lane.b32.xlu0 %v870_v8, %s1182_s17 }
 0xa7e   : > { %v453_v12 = vpop.permute.xlu2 %452 }
 0xa7f   : > { %456 = vst.msk [vmem:[%s1269_s21] sm:$0x3] %vm455_vm14, %v453_v12 }
 0xa81   : > { %545 = vrot.lane.b32.xlu0 %v1347_v10, %s1183_s22 }
 0xa86   : > { %v720_v13 = vpop.permute.xlu2 %719 }
 0xa87   : > { %1098 = vst.msk [vmem:[%s1274_s25 + $0x2] sm:$0x3] %vm455_vm14, %v720_v13 }
 0xa89   : > { %806 = vrot.lane.b32.xlu0 %v805_v48, %s1183_s22 }
 0xaeb   : > { %v873_v59 = vpop.permute.xlu0 %872 }
 0xaec   : > { %v875_v17 = vadd.f32 %v873_v59, %v865_v16 }
 0xaee   : > { %1172 = vtanh.f32 %v875_v17  ;;  %v887_v56 = vsel %vm885_vm0, %v875_v17, %v715_v14 }
 0xaf3   : > { %v546_v18 = vpop.permute.xlu0 %545 }
 0xaf4   : > { %v1173_v19 = vpop.eup %1172  ;;  %1086 = vst.msk [vmem:[%s1274_s25 + $0x4] sm:$0x3] %vm455_vm14, %v546_v18 }
 0xaf5   : > { %878 = vrot.lane.b32.xlu1 %v1173_v19, %s1182_s17 }
 0xafb   : > { %v807_v10 = vpop.permute.xlu0 %806 }
 0xafc   : > { %1102 = vst.msk [vmem:[%s1269_s21 + $0x4] sm:$0x3] %vm455_vm14, %v807_v10 }
 0xafd   : > { %632 = vrot.lane.b32.xlu1 %v1374_v44, %s1183_s22  ;;  %v802_v44 = vsel %vm800_vm15, %v1411_v42, %v1408_v39 }
 0xb67   : > { %v879_v5 = vpop.permute.xlu1 %878 }
 0xb68   : > { %v881_v9 = vmul.f32 %v879_v5, %v862_v7 }
 0xb6a   : > { %889 = vst [vmem:[#allocation1] ss:$4 sm:$0xff] %v881_v9  ;;  %v886_v25 = vsel %vm885_vm0, %v881_v9, %v1421_v37 }
 0xb6f   : > { %v633_v21 = vpop.permute.xlu1 %632 }
 0xb70   : > { %1090 = vst.msk [vmem:[%s1269_s21 + $0x2] sm:$0x3] %vm455_vm14, %v633_v21  ;;  %s1184_s21 = smov 96  }
 0xb71   : > { %v890_v23 = vld.sshfl [vmem:[#allocation1] sm:$0xff pattern:$0x73625140] }
 0xb72   : > { %891 = vrot.lane.b32.xlu1 %v890_v23, %s1183_s22  ;;  %896 = vst [vmem:[#allocation1] ss:$4 sm:$0xff] %v801_v22 }
 0xb79   : > { %v897_v11 = vld.sshfl [vmem:[#allocation1] sm:$0xff pattern:$0x73625140] }
 0xb7a   : > { %898 = vrot.lane.b32.xlu2 %v897_v11, %s1183_s22  ;;  %903 = vst [vmem:[#allocation1] ss:$4 sm:$0xff] %v802_v44 }
 0xb81   : > { %v904_v26 = vld.sshfl [vmem:[#allocation1] sm:$0xff pattern:$0x73625140] }
 0xb82   : > { %905 = vrot.lane.b32.xlu0 %v904_v26, %s1184_s21  ;;  %910 = vst [vmem:[#allocation1] ss:$4 sm:$0xff] %v886_v25 }
 0xb89   : > { %v911_v27 = vld.sshfl [vmem:[#allocation1] sm:$0xff pattern:$0x73625140] }
 0xb8a   : > { %912 = vrot.lane.b32.xlu1 %v911_v27, %s1183_s22  ;;  %917 = vst [vmem:[#allocation1] ss:$4 sm:$0xff] %v887_v56 }
 0xb91   : > { %v918_v28 = vld.sshfl [vmem:[#allocation1] sm:$0xff pattern:$0x73625140] }
 0xb92   : > { %919 = vrot.lane.b32.xlu2 %v918_v28, %s1184_s21 }
 0xbd4   : > { %v899_v29 = vpop.permute.xlu2 %898 }
 0xbd5   : > { %901 = vst.msk [vmem:[#allocation2] sm:$0x3] %vm455_vm14, %v899_v29 }
 0xbe4   : > { %v892_v30 = vpop.permute.xlu1 %891 }
 0xbe5   : > { %894 = vst.msk [vmem:[%s1274_s25] sm:$0x3] %vm455_vm14, %v892_v30  ;;  %s1186_s25 = smov (!%p1110_p10), 96  }
 0xbec   : > { %v920_v31 = vpop.permute.xlu2 %919 }
 0xbed   : > { %922 = vst.msk [vmem:[#allocation3 + $0x2] sm:$0x3] %vm455_vm14, %v920_v31 }
 0xbf4   : > { %v906_v15 = vpop.permute.xlu0 %905 }
 0xbf5   : > { %908 = vst.msk [vmem:[#allocation3] sm:$0x3] %vm455_vm14, %v906_v15 }
 0xbf9   : > { %926 = sbr.rel (%p1110_p10) target bundleno = 3210 (0xc8a), region = 48 }
 0xbfc   : > { %v913_v32 = vpop.permute.xlu1 %912 }
 0xbfd   : > { %915 = vst.msk [vmem:[#allocation2 + $0x2] sm:$0x3] %vm455_vm14, %v913_v32 }
 0xbfe   : > { %927 = vst [vmem:[#allocation1] ss:$4 sm:$0xff] %v801_v22 }
 0xbff   : > { %930 = vst [vmem:[#allocation1 + $0x20] ss:$4 sm:$0xff] %v886_v25 }
 0xc05   : > { %v928_v33 = vld.sshfl [vmem:[#allocation1] sm:$0xff pattern:$0x73625140] }
 0xc06   : > { %932 = vrot.lane.b32.xlu0 %v928_v33, %s1185_s9  ;;  %940 = vst [vmem:[#allocation1] ss:$4 sm:$0xff] %v802_v44  ;;  %v931_v35 = vld.sshfl [vmem:[#allocation1 + $0x20] sm:$0xff pattern:$0x73625140] }
 0xc07   : > { %943 = vst [vmem:[#allocation1 + $0x20] ss:$4 sm:$0xff] %v887_v56 }
 0xc0d   : > { %v941_v36 = vld.sshfl [vmem:[#allocation1] sm:$0xff pattern:$0x73625140] }
 0xc0e   : > { %945 = vrot.lane.b32.xlu1 %v941_v36, %s1186_s25  ;;  %934 = vrot.lane.b32.xlu0 %v931_v35, %s1185_s9  ;;  %v944_v38 = vld.sshfl [vmem:[#allocation1 + $0x20] sm:$0xff pattern:$0x73625140] }
 0xc16   : > { %947 = vrot.lane.b32.xlu1 %v944_v38, %s1186_s25 }
 0xc78   : > { %v933_v39 = vpop.permute.xlu0 %932 }
 0xc79   : > { %938 = vst.msk [vmem:[%s1496_s7] sm:$0x3] %vm455_vm14, %v933_v39 }
 0xc80   : > { %v946_v40 = vpop.permute.xlu1 %945  ;;  %v935_v41 = vpop.permute.xlu0 %934 }
 0xc81   : > { %951 = vst.msk [vmem:[%s1497_s8] sm:$0x3] %vm455_vm14, %v946_v40 }
 0xc82   : > { %939 = vst.msk [vmem:[%s1496_s7 + $0x2] sm:$0x3] %vm455_vm14, %v935_v41 }
 0xc88   : > { %v948_v42 = vpop.permute.xlu1 %947 }
 0xc89   : > { %952 = vst.msk [vmem:[%s1497_s8 + $0x2] sm:$0x3] %vm455_vm14, %v948_v42 }
 0xc8a PF: > { %s19_s27 = sadd.s32 1, %s1180_s27  }
 0xc8b   : > { %p16_p11 = scmp.ge.s32.totalorder %s19_s27, 5  }
 0xc8d   :  { %18 = sbr.rel (!%p16_p11) target bundleno = 1 (0x1), region = 122 }

</bundles_post_ra>
